<compile_context>
chip_gen: v7x
topology: tpu7x:2x2x1
jax: 0.10.0
libtpu: 0.0.40
codegen_flags: <defaults>
</compile_context>

<pallas_src>
import functools

import jax
import jax.numpy as jnp
import numpy as np
from jax.experimental import pallas as pl
from jax.experimental.pallas import tpu as pltpu  # noqa: F401  (TPU backend assumed)

_BN_EPS = 1e-5
# Eval-mode BatchNorm with default running stats (mean=0, var=1, gamma=1, beta=0)
# reduces to a uniform scale 1/sqrt(1+eps); folded into conv weights/biases at init.
_BN_SCALE = float(1.0 / np.sqrt(1.0 + _BN_EPS))
_K = 5          # TemporalConv kernel size (K5-P2-K5-P2)
_FEAT = 512     # backbone feature dim
_KD = 256       # DFT bins computed on the MXU (bins 0..255; Nyquist bin 256 via VPU)
_NT_PAD = 256   # conv-tap output columns (hidden*K = 160 padded to a lane multiple)


# -----------------------------------------------------------------------------
# Pallas kernel: backbone + |DFT| + conv1 taps of both TemporalConv stacks
# -----------------------------------------------------------------------------

def _front_kernel(frames_ref, bbw_ref, bbb_ref, dftcs_ref, nyqrow_ref,
                  wm1_ref, wm2_ref, wnyq_ref, z1_ref, z2_ref):
    # Backbone projection (stand-in for resnet34MAM): bf16 MXU, f32 accumulate.
    fw = jnp.dot(frames_ref[...], bbw_ref[...], preferred_element_type=jnp.float32)
    fw = fw + bbb_ref[...]

    # Nyquist bin of the real length-512 FFT: X[256] = sum_n x[n]*(-1)^n / N.
    # Consumes fw immediately (f32 copy can retire); XLU lane-reduce, free-ish slot.
    nyq = jnp.abs(jnp.sum(fw * nyqrow_ref[...], axis=-1, keepdims=True))   # (BT, 1)

    fwb = fw.astype(jnp.bfloat16)

    # Time-domain stream conv1 taps (issued before the magnitude epilogue).
    z1_ref[...] = jnp.dot(fwb, wm1_ref[...], preferred_element_type=jnp.float32)

    # Half-spectrum real DFT, bins 0..255: cos|sin concatenated -> ONE MXU dot.
    rei = jnp.dot(fwb, dftcs_ref[...], preferred_element_type=jnp.float32)  # (BT, 2*KD)
    re = rei[:, :_KD]
    im = rei[:, _KD:]
    m2 = re * re
    m2 = m2 + im * im
    # Magnitude epilogue in f32 (v5e VPU/EUP has no bf16); cast right after the sqrt.
    mag = jnp.sqrt(m2).astype(jnp.bfloat16)

    # Frequency-domain stream conv1 taps (+ rank-1 Nyquist contribution, VPU).
    z2 = jnp.dot(mag, wm2_ref[...], preferred_element_type=jnp.float32)
    z2_ref[...] = z2 + nyq * wnyq_ref[...]


def fused_frontend(frames_bf16, bb_w, bb_b, dft_cs, nyq_row, wm1, wm2, wnyq):
    """Single-block (gridless) fused kernel: backbone + |DFT| + conv1-taps of both streams.

    ~2 MiB of weights in VMEM (vs 32 MiB scoped default on all gens); at BT=48 the call
    is weight-DMA / launch-latency bound, so no grid is used. If BT grows to >= ~512,
    add a grid over BT with block 256, constant weight index_maps, and
    dimension_semantics=("parallel",) to engage both v7x TensorCores.
    """
    BT, IN = frames_bf16.shape
    F = bb_w.shape[1]
    KD2 = dft_cs.shape[1]
    NT = wm1.shape[1]
    flops = 2 * BT * (IN * F + F * KD2 + F * NT + (KD2 // 2) * NT)
    bytes_accessed = int(frames_bf16.size * 2 + bb_w.size * 2 + bb_b.size * 4
                         + dft_cs.size * 2 + nyq_row.size * 4
                         + wm1.size * 2 + wm2.size * 2 + wnyq.size * 4
                         + 2 * BT * NT * 4)
    return pl.pallas_call(
        _front_kernel,
        out_shape=(jax.ShapeDtypeStruct((BT, NT), jnp.float32),
                   jax.ShapeDtypeStruct((BT, NT), jnp.float32)),
        in_specs=[
            pl.BlockSpec((BT, IN), lambda: (0, 0)),
            pl.BlockSpec((IN, F), lambda: (0, 0)),
            pl.BlockSpec((1, F), lambda: (0, 0)),
            pl.BlockSpec((F, KD2), lambda: (0, 0)),
            pl.BlockSpec((1, F), lambda: (0, 0)),
            pl.BlockSpec((F, NT), lambda: (0, 0)),
            pl.BlockSpec((KD2 // 2, NT), lambda: (0, 0)),
            pl.BlockSpec((1, NT), lambda: (0, 0)),
        ],
        out_specs=(pl.BlockSpec((BT, NT), lambda: (0, 0)),
                   pl.BlockSpec((BT, NT), lambda: (0, 0))),
        cost_estimate=pl.CostEstimate(flops=flops, transcendentals=BT * (KD2 // 2),
                                      bytes_accessed=bytes_accessed),
    )(frames_bf16, bb_w, bb_b, dft_cs, nyq_row, wm1, wm2, wnyq)


# -----------------------------------------------------------------------------
# JAX glue (tiny ops: tap shift-adds, pooling, LSTM recurrence, classifier heads)
# -----------------------------------------------------------------------------

def tap_combine(z, B, T, Hout, K, bias):
    """Combine per-tap conv contributions z[(b,t), h*K+tap] -> relu(conv + bias)."""
    z = z[:, : Hout * K].reshape(B, T, Hout, K)
    To = T - K + 1
    y = z[:, 0:To, :, 0]
    for tap in range(1, K):
        y = y + z[:, tap:tap + To, :, tap]
    y = jnp.maximum(y + bias[None, None, :], 0.0)
    return y.transpose(0, 2, 1)                      # (B, Hout, To)


def maxpool1d_k2(x):
    B, C, T = x.shape
    To = T // 2
    return x[:, :, : To * 2].reshape(B, C, To, 2).max(axis=-1)


def conv1d_bn_relu_small(x, wm, bias, K=_K):
    """Second conv layer of TemporalConv: tiny (B*T, C)@(C, Hout*K) — plain XLA dot."""
    B, C, T = x.shape
    Hout = wm.shape[1] // K
    z = x.transpose(0, 2, 1).reshape(B * T, C) @ wm
    return tap_combine(z, B, T, Hout, K, bias)


def lstm_scan(gates_x, whh_t):
    """gates_x: (T, B, 4*Hc) pre-projected input gates (PyTorch order i,f,g,o)."""
    _, B, G = gates_x.shape
    Hc = G // 4

    def step(carry, gx):
        h, c = carry
        g = gx + h @ whh_t
        i, f, gg, o = jnp.split(g, 4, axis=-1)
        i = jax.nn.sigmoid(i)
        f = jax.nn.sigmoid(f)
        gg = jnp.tanh(gg)
        o = jax.nn.sigmoid(o)
        c = f * c + i * gg
        h = o * jnp.tanh(c)
        return (h, c), h

    h0 = jnp.zeros((B, Hc), jnp.float32)
    c0 = jnp.zeros((B, Hc), jnp.float32)
    _, hs = jax.lax.scan(step, (h0, c0), gates_x)
    return hs


def bilstm(x, layers):
    """BiLSTMLayer: 2-layer bidirectional LSTM, per-direction hidden = H//2.

    The fwd/bwd input projections are fused into one (H, 8*Hc)=(32,128) dot (XLA);
    only the tiny recurrences run as lax.scan.
    """
    out = x
    for lp in layers:
        T, B, H = out.shape
        gates = out.reshape(T * B, H) @ lp["w_ih_cat"] + lp["b_cat"]
        gates = gates.reshape(T, B, -1)
        gf, gb = jnp.split(gates, 2, axis=-1)
        fwd = lstm_scan(gf, lp["whh_f_t"])
        bwd = lstm_scan(gb[::-1], lp["whh_b_t"])[::-1]
        out = jnp.concatenate([fwd, bwd], axis=-1)
    return out                                       # (T, B, H) 'predictions'


# -----------------------------------------------------------------------------
# Parameters: raw (PyTorch convention) + one-time inference folding
# -----------------------------------------------------------------------------

def init_params(key, hidden=32, vocab=40, in_feat=768, feat_dim=_FEAT):
    keys = list(jax.random.split(key, 64))
    kit = iter(keys)

    def nrm(shape, scale):
        return jax.random.normal(next(kit), shape, jnp.float32) * scale

    p = {}
    # TODO(synk): stand-in for resnet34MAM — per-frame linear projection to 512 features.
    p["bb_w"] = nrm((in_feat, feat_dim), 1.0 / np.sqrt(in_feat))
    p["bb_b"] = jnp.zeros((feat_dim,), jnp.float32)

    def tconv(cin):
        return {
            "w1": nrm((hidden, cin, _K), 1.0 / np.sqrt(cin * _K)),
            "b1": nrm((hidden,), 0.01),
            "w2": nrm((hidden, hidden, _K), 1.0 / np.sqrt(hidden * _K)),
            "b2": nrm((hidden,), 0.01),
        }

    p["tc1"] = tconv(feat_dim)      # self.conv1d
    p["tc2"] = tconv(feat_dim)      # self.conv1d1

    hc = hidden // 2

    def lstm_params():
        layers = []
        for _ in range(2):
            lp = {}
            for d in ("fwd", "bwd"):
                lp[d] = dict(
                    W_ih=nrm((4 * hc, hidden), 1.0 / np.sqrt(hidden)),
                    W_hh=nrm((4 * hc, hc), 1.0 / np.sqrt(hc)),
                    b_ih=jnp.zeros((4 * hc,), jnp.float32),
                    b_hh=jnp.zeros((4 * hc,), jnp.float32),
                )
            layers.append(lp)
        return layers

    p["lstm1"] = lstm_params()      # self.temporal_model
    p["lstm2"] = lstm_params()      # self.temporal_model1

    p["cls11"] = nrm((hidden, vocab), 1.0 / np.sqrt(hidden))  # classifier11 (=22)
    p["cls33"] = nrm((hidden, vocab), 1.0 / np.sqrt(hidden))  # classifier33 (=44)
    p["cls55"] = nrm((hidden, vocab), 1.0 / np.sqrt(hidden))  # classifier55
    return p


def prepare_params(p, hidden=32, feat_dim=_FEAT):
    """One-time folding: BN eval scale, 1/N DFT norm, half-spectrum symmetry,
    per-tap weight layout, lane padding, bf16 casts, fused LSTM projections,
    and pre-normalized classifier weights (static at inference)."""
    pp = {}
    pp["bb_w"] = p["bb_w"].astype(jnp.bfloat16)
    pp["bb_b"] = p["bb_b"].reshape(1, feat_dim).astype(jnp.float32)

    half = feat_dim // 2  # 256

    # Fused half-spectrum real-DFT matrix: [cos | sin] for bins 0..255 in ONE (512, 512)
    # bf16 weight ('forward' 1/N norm folded in). Nyquist bin (256) handled separately.
    f = np.arange(feat_dim)[:, None].astype(np.float64)
    k = np.arange(_KD)[None, :].astype(np.float64)
    ang = 2.0 * np.pi * (f * k) / feat_dim
    cs = np.concatenate([np.cos(ang), np.sin(ang)], axis=1) / feat_dim   # (512, 2*KD)
    pp["dft_cs"] = jnp.asarray(cs, jnp.bfloat16)
    # Nyquist row: X[256] = sum_n x[n]*(-1)^n / N (computed on the VPU/XLU in-kernel).
    pp["nyq_row"] = jnp.asarray(
        (((-1.0) ** np.arange(feat_dim)) / feat_dim).reshape(1, feat_dim), jnp.float32)

    def tap_matrix(w, pad_to=None, dtype=jnp.float32):
        # (Hout, C, K) -> (C, Hout*K) with eval-BN scale folded; optional lane padding.
        Hout, C, K = w.shape
        wm = (w * _BN_SCALE).transpose(1, 0, 2).reshape(C, Hout * K)
        if pad_to is not None and pad_to > Hout * K:
            wm = jnp.pad(wm, ((0, 0), (0, pad_to - Hout * K)))
        return wm.astype(dtype)

    # TemporalConv #1 (time-domain stream).
    pp["tc1_wm1"] = tap_matrix(p["tc1"]["w1"], pad_to=_NT_PAD, dtype=jnp.bfloat16)
    pp["tc1_b1"] = p["tc1"]["b1"] * _BN_SCALE
    pp["tc1_wm2"] = tap_matrix(p["tc1"]["w2"])
    pp["tc1_b2"] = p["tc1"]["b2"] * _BN_SCALE

    # TemporalConv #2 (|FFT| stream): fold |X[c]| == |X[N-c]| into the first conv
    # weight so the kernel only needs bins 0..255; bin 256 (Nyquist) gets its own
    # rank-1 weight row added in-kernel.
    w = p["tc2"]["w1"]                                        # (hidden, 512, K)
    w_eff = jnp.zeros((hidden, half, _K), jnp.float32)
    w_eff = w_eff.at[:, 0, :].set(w[:, 0, :])
    w_eff = w_eff.at[:, 1:half, :].set(w[:, 1:half, :] + w[:, :half:-1, :])
    pp["tc2_wm1"] = tap_matrix(w_eff, pad_to=_NT_PAD, dtype=jnp.bfloat16)  # (256, 256)
    wnyq = (w[:, half, :] * _BN_SCALE).reshape(1, hidden * _K)
    pp["tc2_wnyq"] = jnp.pad(wnyq, ((0, 0), (0, _NT_PAD - hidden * _K))).astype(jnp.float32)
    pp["tc2_b1"] = p["tc2"]["b1"] * _BN_SCALE
    pp["tc2_wm2"] = tap_matrix(p["tc2"]["w2"])
    pp["tc2_b2"] = p["tc2"]["b2"] * _BN_SCALE

    def prep_lstm(layers):
        out = []
        for lp in layers:
            fw, bw = lp["fwd"], lp["bwd"]
            out.append({
                "w_ih_cat": jnp.concatenate([fw["W_ih"].T, bw["W_ih"].T], axis=1),
                "b_cat": jnp.concatenate([fw["b_ih"] + fw["b_hh"],
                                          bw["b_ih"] + bw["b_hh"]]),
                "whh_f_t": fw["W_hh"].T,
                "whh_b_t": bw["W_hh"].T,
            })
        return out

    pp["lstm1"] = prep_lstm(p["lstm1"])
    pp["lstm2"] = prep_lstm(p["lstm2"])

    # NormLinear heads: columns L2-normalized once (weights static at inference),
    # concatenated [cls11 | cls33 | cls55]. Applied as ONE plain-XLA dot in forward.
    ws = jnp.concatenate([p["cls11"], p["cls33"], p["cls55"]], axis=1)    # (H, 3V)
    ws = ws / jnp.maximum(jnp.sqrt(jnp.sum(ws * ws, axis=0, keepdims=True)), 1e-12)
    pp["cls_w"] = ws.astype(jnp.float32)
    return pp


# -----------------------------------------------------------------------------
# moduleNet.forward — 'TFNet' branch
# -----------------------------------------------------------------------------

@functools.partial(jax.jit, static_argnames=("isTrain",))
def tfnet_forward(seqData, dataLen, pp, isTrain=True):
    B, T, C, Hh, Ww = seqData.shape
    BT = B * T
    hidden = pp["tc1_b1"].shape[0]
    vocab = pp["cls_w"].shape[1] // 3

    # Backbone stand-in + |FFT| + first conv layers of BOTH TemporalConv stacks,
    # fused in one Pallas kernel (512-wide activations never round-trip HBM).
    frames = seqData.reshape(BT, C * Hh * Ww).astype(jnp.bfloat16)
    z1, z2 = fused_frontend(frames, pp["bb_w"], pp["bb_b"],
                            pp["dft_cs"], pp["nyq_row"],
                            pp["tc1_wm1"], pp["tc2_wm1"], pp["tc2_wnyq"])
    outData1 = outData2 = outData3 = None  # TODO(synk): MAM intermediate feature maps not produced.

    def temporal_tail(z, b1, wm2, b2):
        y = tap_combine(z, B, T, hidden, _K, b1)      # K5 (+ eval-BN, ReLU)
        y = maxpool1d_k2(y)                           # P2
        y = conv1d_bn_relu_small(y, wm2, b2)          # K5 (+ eval-BN, ReLU)
        return maxpool1d_k2(y)                        # P2

    x_feat = temporal_tail(z1, pp["tc1_b1"], pp["tc1_wm2"], pp["tc1_b2"])
    x1_feat = temporal_tail(z2, pp["tc2_b1"], pp["tc2_wm2"], pp["tc2_b2"])
    lgt = ((dataLen - (_K - 1)) // 2 - (_K - 1)) // 2

    x = x_feat.transpose(2, 0, 1)                    # (T', B, hidden)
    x1 = x1_feat.transpose(2, 0, 1)

    outputs = bilstm(x, pp["lstm1"])                 # temporal_model
    outputs1 = bilstm(x1, pp["lstm2"])               # temporal_model1

    # All five NormLinear heads: inputs stacked along M, pre-normalized weights
    # [cls11 | cls33 | cls55] -> ONE tiny plain-XLA matmul (micro-matmul belongs to XLA).
    Tp = x.shape[0]
    TB = Tp * B
    X = jnp.concatenate([outputs, x, outputs1, x1, outputs + outputs1],
                        axis=0).reshape(5 * TB, hidden)
    Y = X @ pp["cls_w"]                               # (5*TB, 3*vocab)

    def block(i, w0):
        return Y[i * TB:(i + 1) * TB, w0:w0 + vocab].reshape(Tp, B, vocab)

    logProbs1 = block(0, 0)           # classifier11(outputs)
    logProbs2 = block(1, 0)           # classifier22 (= classifier11) on x
    logProbs3 = block(2, vocab)       # classifier33(outputs1)
    logProbs4 = block(3, vocab)       # classifier44 (= classifier33) on x1
    logProbs5 = block(4, 2 * vocab)   # classifier55(outputs + outputs1)
    if not isTrain:
        logProbs1 = logProbs5

    return (logProbs1, logProbs2, logProbs3, logProbs4, logProbs5,
            lgt, outData1, outData2, outData3)


# -----------------------------------------------------------------------------
# Main
# -----------------------------------------------------------------------------

if __name__ == "__main__":
    key = jax.random.PRNGKey(0)
    k_in, k_par = jax.random.split(key)

    B, T, C, Hh, Ww = 2, 24, 3, 16, 16
    HIDDEN, VOCAB = 32, 40

    seqData = jax.random.normal(k_in, (B, T, C, Hh, Ww), jnp.float32)
    dataLen = jnp.array([T, T], dtype=jnp.int32)

    raw = init_params(k_par, hidden=HIDDEN, vocab=VOCAB,
                      in_feat=C * Hh * Ww, feat_dim=_FEAT)
    params = prepare_params(raw, hidden=HIDDEN, feat_dim=_FEAT)

    outs = tfnet_forward(seqData, dataLen, params, isTrain=True)
    for o in outs:
        if o is not None:
            jax.block_until_ready(o)

    # sanity: T' = ((24-4)//2 - 4)//2 = 3
    Tp = ((T - 4) // 2 - 4) // 2
    assert outs[0].shape == (Tp, B, VOCAB)
    assert outs[1].shape == (Tp, B, VOCAB)
    assert outs[4].shape == (Tp, B, VOCAB)
    assert outs[5].shape == (B,)
    assert bool(jnp.all(jnp.isfinite(outs[0])))
    assert bool(jnp.all(jnp.isfinite(outs[4])))

    print("KERNEL_OK")
</pallas_src>

<mosaic_0001>
module attributes {stable_mosaic.version = 11 : i64} {
  func.func @_front_kernel(%arg0: memref<48x768xbf16, #tpu.memory_space<vmem>>, %arg1: memref<768x512xbf16, #tpu.memory_space<vmem>>, %arg2: memref<1x512xf32, #tpu.memory_space<vmem>>, %arg3: memref<512x512xbf16, #tpu.memory_space<vmem>>, %arg4: memref<1x512xf32, #tpu.memory_space<vmem>>, %arg5: memref<512x256xbf16, #tpu.memory_space<vmem>>, %arg6: memref<256x256xbf16, #tpu.memory_space<vmem>>, %arg7: memref<1x256xf32, #tpu.memory_space<vmem>>, %arg8: memref<48x256xf32, #tpu.memory_space<vmem>>, %arg9: memref<48x256xf32, #tpu.memory_space<vmem>>) attributes {dimension_semantics = [], scalar_prefetch = 0 : i64, scratch_operands = 0 : i64, tpu.core_type = #tpu.core_type<tc>} {
    %c0 = arith.constant 0 : index
    %c0_0 = arith.constant 0 : index
    %0 = vector.load %arg0[%c0, %c0_0] : memref<48x768xbf16, #tpu.memory_space<vmem>>, vector<48x768xbf16>
    %c0_1 = arith.constant 0 : index
    %c0_2 = arith.constant 0 : index
    %1 = vector.load %arg1[%c0_1, %c0_2] : memref<768x512xbf16, #tpu.memory_space<vmem>>, vector<768x512xbf16>
    %cst = arith.constant dense<0.000000e+00> : vector<48x512xf32>
    %2 = tpu.matmul %0, %1, %cst {dimension_numbers = #tpu.dot_dimension_numbers<[1], [0], [0], [1], [0, 0, 1, 1], [], []>} : vector<48x768xbf16>, vector<768x512xbf16>, vector<48x512xf32> -> vector<48x512xf32>
    %c0_3 = arith.constant 0 : index
    %c0_4 = arith.constant 0 : index
    %3 = vector.load %arg2[%c0_3, %c0_4] : memref<1x512xf32, #tpu.memory_space<vmem>>, vector<1x512xf32>
    %4 = vector.broadcast %3 : vector<1x512xf32> to vector<48x512xf32>
    %5 = arith.addf %2, %4 : vector<48x512xf32>
    %c0_5 = arith.constant 0 : index
    %c0_6 = arith.constant 0 : index
    %6 = vector.load %arg4[%c0_5, %c0_6] : memref<1x512xf32, #tpu.memory_space<vmem>>, vector<1x512xf32>
    %7 = vector.broadcast %6 : vector<1x512xf32> to vector<48x512xf32>
    %8 = arith.mulf %5, %7 : vector<48x512xf32>
    %cst_7 = arith.constant dense<0.000000e+00> : vector<48xf32>
    %9 = vector.multi_reduction <add>, %8, %cst_7 [1] : vector<48x512xf32> to vector<48xf32>
    %10 = vector.shape_cast %9 : vector<48xf32> to vector<48x1xf32>
    %11 = math.absf %10 : vector<48x1xf32>
    %12 = arith.truncf %5 : vector<48x512xf32> to vector<48x512xbf16>
    %c0_8 = arith.constant 0 : index
    %c0_9 = arith.constant 0 : index
    %13 = vector.load %arg5[%c0_8, %c0_9] : memref<512x256xbf16, #tpu.memory_space<vmem>>, vector<512x256xbf16>
    %cst_10 = arith.constant dense<0.000000e+00> : vector<48x256xf32>
    %14 = tpu.matmul %12, %13, %cst_10 {dimension_numbers = #tpu.dot_dimension_numbers<[1], [0], [0], [1], [0, 0, 1, 1], [], []>} : vector<48x512xbf16>, vector<512x256xbf16>, vector<48x256xf32> -> vector<48x256xf32>
    %c0_11 = arith.constant 0 : index
    %c0_12 = arith.constant 0 : index
    %15 = vector.load %arg8[%c0_11, %c0_12] : memref<48x256xf32, #tpu.memory_space<vmem>>, vector<48x256xf32>
    tpu.vector_store %arg8[%c0_11, %c0_12], %14 {strides = array<i32>} : memref<48x256xf32, #tpu.memory_space<vmem>>, vector<48x256xf32>,
    %c0_13 = arith.constant 0 : index
    %c0_14 = arith.constant 0 : index
    %16 = vector.load %arg3[%c0_13, %c0_14] : memref<512x512xbf16, #tpu.memory_space<vmem>>, vector<512x512xbf16>
    %cst_15 = arith.constant dense<0.000000e+00> : vector<48x512xf32>
    %17 = tpu.matmul %12, %16, %cst_15 {dimension_numbers = #tpu.dot_dimension_numbers<[1], [0], [0], [1], [0, 0, 1, 1], [], []>} : vector<48x512xbf16>, vector<512x512xbf16>, vector<48x512xf32> -> vector<48x512xf32>
    %18 = vector.extract_strided_slice %17 {offsets = [0, 0], sizes = [48, 256], strides = [1, 1]} : vector<48x512xf32> to vector<48x256xf32>
    %19 = vector.extract_strided_slice %17 {offsets = [0, 256], sizes = [48, 256], strides = [1, 1]} : vector<48x512xf32> to vector<48x256xf32>
    %20 = arith.mulf %18, %18 : vector<48x256xf32>
    %21 = arith.mulf %19, %19 : vector<48x256xf32>
    %22 = arith.addf %20, %21 : vector<48x256xf32>
    %23 = math.sqrt %22 : vector<48x256xf32>
    %24 = arith.truncf %23 : vector<48x256xf32> to vector<48x256xbf16>
    %c0_16 = arith.constant 0 : index
    %c0_17 = arith.constant 0 : index
    %25 = vector.load %arg6[%c0_16, %c0_17] : memref<256x256xbf16, #tpu.memory_space<vmem>>, vector<256x256xbf16>
    %cst_18 = arith.constant dense<0.000000e+00> : vector<48x256xf32>
    %26 = tpu.matmul %24, %25, %cst_18 {dimension_numbers = #tpu.dot_dimension_numbers<[1], [0], [0], [1], [0, 0, 1, 1], [], []>} : vector<48x256xbf16>, vector<256x256xbf16>, vector<48x256xf32> -> vector<48x256xf32>
    %c0_19 = arith.constant 0 : index
    %c0_20 = arith.constant 0 : index
    %27 = vector.load %arg7[%c0_19, %c0_20] : memref<1x256xf32, #tpu.memory_space<vmem>>, vector<1x256xf32>
    %28 = vector.broadcast %11 : vector<48x1xf32> to vector<48x256xf32>
    %29 = vector.broadcast %27 : vector<1x256xf32> to vector<48x256xf32>
    %30 = arith.mulf %28, %29 : vector<48x256xf32>
    %31 = arith.addf %26, %30 : vector<48x256xf32>
    %c0_21 = arith.constant 0 : index
    %c0_22 = arith.constant 0 : index
    %32 = vector.load %arg9[%c0_21, %c0_22] : memref<48x256xf32, #tpu.memory_space<vmem>>, vector<48x256xf32>
    tpu.vector_store %arg9[%c0_21, %c0_22], %31 {strides = array<i32>} : memref<48x256xf32, #tpu.memory_space<vmem>>, vector<48x256xf32>,
    return
  }
}

</mosaic_0001>

<bundles_post_ra>
// kernel: tfnet_forward.1
= control target key start
LH: loop header
LB: loop body
LE: loop exit
PB: predicated region body
PF: predicated region fallthrough
CT: control target
= control target key end

     0   :  { %s6654_s1 = inlined_call_operand.vmem [shape: bf16[768,512], index: 1, kind: input, shape index: {}]   ;;  %s6655_s0 = inlined_call_operand.vmem [shape: bf16[48,768], index: 0, kind: input, shape index: {}]   ;;  %s6656_s5 = inlined_call_operand.vmem [shape: bf16[512,256], index: 5, kind: input, shape index: {}]   ;;  %s6657_s3 = inlined_call_operand.vmem [shape: bf16[512,512], index: 3, kind: input, shape index: {}]   ;;  %s6658_s2 = inlined_call_operand.vmem [shape: f32[1,512], index: 2, kind: input, shape index: {}]   ;;  %s6659_s4 = inlined_call_operand.vmem [shape: f32[1,512], index: 4, kind: input, shape index: {}]   ;;  %s6660_s6 = inlined_call_operand.vmem [shape: bf16[256,256], index: 6, kind: input, shape index: {}]   ;;  %s6661_s8 = inlined_call_operand.vmem [shape: f32[48,256], index: 8, kind: output, shape index: {0}]   ;;  %s6662_s7 = inlined_call_operand.vmem [shape: f32[1,256], index: 7, kind: input, shape index: {}]   ;;  %s6663_s9 = inlined_call_operand.vmem [shape: f32[48,256], index: 9, kind: output, shape index: {1}]  }
   0x1   :  { %v4294_v0 = vld [vmem:[%s6654_s1 + $0x4] ss:$16 sps:$4 sm:$0xff]   ;;  %v4296_v1 = vld [vmem:[%s6654_s1 + $0xc] ss:$16 sps:$4 sm:$0xff]   ;;  %v4298_v2 = vld [vmem:[%s6654_s1] ss:$16 sps:$4 sm:$0xff]  }
   0x2   :  { %1313 = vmatprep.subr.bf16.mxu0 %v4294_v0  ;;  %v4299_v3 = vld [vmem:[%s6654_s1 + $0x8] ss:$16 sps:$4 sm:$0xff]   ;;  %1502 = vmatprep.subr.bf16.mxu1 %v4296_v1  ;;  %v4300_v4 = vld [vmem:[%s6654_s1 + $0x24] ss:$16 sps:$4 sm:$0xff]   ;;  %v4302_v5 = vld [vmem:[%s6654_s1 + $0x2c] ss:$16 sps:$4 sm:$0xff]  }
   0x3   :  { %1314 = vmatpush1.bf16.msra.mxu0 %v4298_v2  ;;  %1503 = vmatpush1.bf16.msra.mxu1 %v4299_v3  ;;  %v4304_v6 = vld [vmem:[%s6654_s1 + $0x20] ss:$16 sps:$4 sm:$0xff]   ;;  %v4305_v7 = vld [vmem:[%s6654_s1 + $0x28] ss:$16 sps:$4 sm:$0xff]   ;;  %v4306_v8 = vld [vmem:[%s6654_s1 + $0x44] ss:$16 sps:$4 sm:$0xff]  }
   0x4   :  { %1315 = vmatprep.subr.bf16.mxu0 %v4300_v4  ;;  %1504 = vmatprep.subr.bf16.mxu1 %v4302_v5  ;;  %v4308_v9 = vld [vmem:[%s6654_s1 + $0x4c] ss:$16 sps:$4 sm:$0xff]   ;;  %v4310_v10 = vld [vmem:[%s6654_s1 + $0x40] ss:$16 sps:$4 sm:$0xff]   ;;  %v4311_v11 = vld [vmem:[%s6654_s1 + $0x48] ss:$16 sps:$4 sm:$0xff]  }
   0x5   :  { %v4312_v12 = vld [vmem:[%s6654_s1 + $0x64] ss:$16 sps:$4 sm:$0xff]   ;;  %v4314_v13 = vld [vmem:[%s6654_s1 + $0x6c] ss:$16 sps:$4 sm:$0xff]   ;;  %v4316_v14 = vld [vmem:[%s6654_s1 + $0x60] ss:$16 sps:$4 sm:$0xff]  }
   0x6   :  { %v4317_v15 = vld [vmem:[%s6654_s1 + $0x68] ss:$16 sps:$4 sm:$0xff]   ;;  %v4318_v16 = vld [vmem:[%s6654_s1 + $0x84] ss:$16 sps:$4 sm:$0xff]   ;;  %v4320_v17 = vld [vmem:[%s6654_s1 + $0x8c] ss:$16 sps:$4 sm:$0xff]  }
   0x7   :  { %1316 = vmatpush1.bf16.msra.mxu0 %v4304_v6  ;;  %1505 = vmatpush1.bf16.msra.mxu1 %v4305_v7  ;;  %v4322_v18 = vld [vmem:[%s6654_s1 + $0x80] ss:$16 sps:$4 sm:$0xff]   ;;  %v4323_v19 = vld [vmem:[%s6654_s1 + $0x88] ss:$16 sps:$4 sm:$0xff]   ;;  %v4324_v20 = vld [vmem:[%s6654_s1 + $0xa4] ss:$16 sps:$4 sm:$0xff]  }
   0x8   :  { %1317 = vmatprep.subr.bf16.mxu0 %v4306_v8  ;;  %1506 = vmatprep.subr.bf16.mxu1 %v4308_v9  ;;  %v4326_v21 = vld [vmem:[%s6654_s1 + $0xac] ss:$16 sps:$4 sm:$0xff]   ;;  %v4328_v22 = vld [vmem:[%s6654_s1 + $0xa0] ss:$16 sps:$4 sm:$0xff]   ;;  %v4329_v23 = vld [vmem:[%s6654_s1 + $0xa8] ss:$16 sps:$4 sm:$0xff]  }
   0x9   :  { %v4330_v24 = vld [vmem:[%s6654_s1 + $0xc4] ss:$16 sps:$4 sm:$0xff]   ;;  %v4332_v25 = vld [vmem:[%s6654_s1 + $0xcc] ss:$16 sps:$4 sm:$0xff]   ;;  %v4334_v26 = vld [vmem:[%s6654_s1 + $0xc0] ss:$16 sps:$4 sm:$0xff]  }
   0xa   :  { %v4335_v27 = vld [vmem:[%s6654_s1 + $0xc8] ss:$16 sps:$4 sm:$0xff]   ;;  %v4336_v28 = vld [vmem:[%s6654_s1 + $0xe4] ss:$16 sps:$4 sm:$0xff]   ;;  %v4338_v29 = vld [vmem:[%s6654_s1 + $0xec] ss:$16 sps:$4 sm:$0xff]  }
   0xb   :  { %1318 = vmatpush1.bf16.msra.mxu0 %v4310_v10  ;;  %1507 = vmatpush1.bf16.msra.mxu1 %v4311_v11  ;;  %v4340_v30 = vld [vmem:[%s6654_s1 + $0xe0] ss:$16 sps:$4 sm:$0xff]   ;;  %v4341_v31 = vld [vmem:[%s6654_s1 + $0xe8] ss:$16 sps:$4 sm:$0xff]   ;;  %v4342_v32 = vld [vmem:[%s6654_s1 + $0x104] ss:$16 sps:$4 sm:$0xff]  }
   0xc   :  { %1319 = vmatprep.subr.bf16.mxu0 %v4312_v12  ;;  %1508 = vmatprep.subr.bf16.mxu1 %v4314_v13  ;;  %v4344_v33 = vld [vmem:[%s6654_s1 + $0x10c] ss:$16 sps:$4 sm:$0xff]   ;;  %v4346_v34 = vld [vmem:[%s6654_s1 + $0x100] ss:$16 sps:$4 sm:$0xff]   ;;  %v4347_v35 = vld [vmem:[%s6654_s1 + $0x108] ss:$16 sps:$4 sm:$0xff]  }
   0xd   :  { %v4348_v36 = vld [vmem:[%s6654_s1 + $0x124] ss:$16 sps:$4 sm:$0xff]   ;;  %v4350_v37 = vld [vmem:[%s6654_s1 + $0x12c] ss:$16 sps:$4 sm:$0xff]   ;;  %v4352_v38 = vld [vmem:[%s6654_s1 + $0x120] ss:$16 sps:$4 sm:$0xff]  }
   0xe   :  { %v4353_v39 = vld [vmem:[%s6654_s1 + $0x128] ss:$16 sps:$4 sm:$0xff]   ;;  %v4354_v40 = vld [vmem:[%s6654_s1 + $0x144] ss:$16 sps:$4 sm:$0xff]   ;;  %v4356_v41 = vld [vmem:[%s6654_s1 + $0x14c] ss:$16 sps:$4 sm:$0xff]  }
   0xf   :  { %1320 = vmatpush1.bf16.msra.mxu0 %v4316_v14  ;;  %1509 = vmatpush1.bf16.msra.mxu1 %v4317_v15  ;;  %v4358_v42 = vld [vmem:[%s6654_s1 + $0x140] ss:$16 sps:$4 sm:$0xff]   ;;  %v4359_v43 = vld [vmem:[%s6654_s1 + $0x148] ss:$16 sps:$4 sm:$0xff]   ;;  %v4360_v44 = vld [vmem:[%s6654_s1 + $0x164] ss:$16 sps:$4 sm:$0xff]  }
  0x10   :  { %1321 = vmatprep.subr.bf16.mxu0 %v4318_v16  ;;  %1510 = vmatprep.subr.bf16.mxu1 %v4320_v17  ;;  %v4362_v45 = vld [vmem:[%s6654_s1 + $0x16c] ss:$16 sps:$4 sm:$0xff]   ;;  %v4364_v46 = vld [vmem:[%s6654_s1 + $0x160] ss:$16 sps:$4 sm:$0xff]   ;;  %v4365_v47 = vld [vmem:[%s6654_s1 + $0x168] ss:$16 sps:$4 sm:$0xff]  }
  0x11   :  { %v4392_v48 = vld [vmem:[%s6655_s0 + $0x4] ss:$24 sps:$4 sm:$0xff]   ;;  %v4370_v51 = vld [vmem:[%s6654_s1 + $0x180] ss:$16 sps:$4 sm:$0xff]   ;;  %v4371_v52 = vld [vmem:[%s6654_s1 + $0x188] ss:$16 sps:$4 sm:$0xff]  }
  0x12   :  { %v4366_v49 = vld [vmem:[%s6654_s1 + $0x184] ss:$16 sps:$4 sm:$0xff]   ;;  %v4368_v50 = vld [vmem:[%s6654_s1 + $0x18c] ss:$16 sps:$4 sm:$0xff]   ;;  %1345 = vmatprep.mubr.bf16.mxu0 %v4392_v48  ;;  %1534 = vmatprep.mubr.bf16.mxu1 %v4392_v48  ;;  %v4376_v55 = vld [vmem:[%s6654_s1 + $0x1a0] ss:$16 sps:$4 sm:$0xff]  }
  0x13   :  { %1322 = vmatpush1.bf16.msra.mxu0 %v4322_v18  ;;  %1511 = vmatpush1.bf16.msra.mxu1 %v4323_v19  ;;  %v4372_v53 = vld [vmem:[%s6654_s1 + $0x1a4] ss:$16 sps:$4 sm:$0xff]   ;;  %v4374_v54 = vld [vmem:[%s6654_s1 + $0x1ac] ss:$16 sps:$4 sm:$0xff]   ;;  %v4377_v56 = vld [vmem:[%s6654_s1 + $0x1a8] ss:$16 sps:$4 sm:$0xff]  }
  0x14   :  { %1323 = vmatprep.subr.bf16.mxu0 %v4324_v20  ;;  %1512 = vmatprep.subr.bf16.mxu1 %v4326_v21  ;;  %v4378_v57 = vld [vmem:[%s6654_s1 + $0x1c4] ss:$16 sps:$4 sm:$0xff]   ;;  %v4380_v58 = vld [vmem:[%s6654_s1 + $0x1cc] ss:$16 sps:$4 sm:$0xff]   ;;  %v4382_v59 = vld [vmem:[%s6654_s1 + $0x1c0] ss:$16 sps:$4 sm:$0xff]  }
  0x15   :  { %v4383_v60 = vld [vmem:[%s6654_s1 + $0x1c8] ss:$16 sps:$4 sm:$0xff]   ;;  %v4384_v61 = vld [vmem:[%s6654_s1 + $0x1e4] ss:$16 sps:$4 sm:$0xff]   ;;  %v4386_v62 = vld [vmem:[%s6654_s1 + $0x1ec] ss:$16 sps:$4 sm:$0xff]  }
  0x16   :  { %v4388_v63 = vld [vmem:[%s6654_s1 + $0x1e0] ss:$16 sps:$4 sm:$0xff]   ;;  %v4389_v0 = vld [vmem:[%s6654_s1 + $0x1e8] ss:$16 sps:$4 sm:$0xff]   ;;  %v4395_v1 = vld [vmem:[%s6654_s1 + $0x204] ss:$16 sps:$4 sm:$0xff]  }
  0x17   :  { %1324 = vmatpush1.bf16.msra.mxu0 %v4328_v22  ;;  %1513 = vmatpush1.bf16.msra.mxu1 %v4329_v23  ;;  %v4398_v2 = vld [vmem:[%s6654_s1 + $0x20c] ss:$16 sps:$4 sm:$0xff]   ;;  %v4390_v3 = vld [vmem:[%s6655_s0] ss:$24 sps:$4 sm:$0xff]   ;;  %v4401_v6 = vld [vmem:[%s6654_s1 + $0x224] ss:$16 sps:$4 sm:$0xff]  }
  0x18   :  { %1325 = vmatprep.subr.bf16.mxu0 %v4330_v24  ;;  %1514 = vmatprep.subr.bf16.mxu1 %v4332_v25  ;;  %v4393_v4 = vld [vmem:[%s6654_s1 + $0x200] ss:$16 sps:$4 sm:$0xff]   ;;  %v4396_v5 = vld [vmem:[%s6654_s1 + $0x208] ss:$16 sps:$4 sm:$0xff]   ;;  %v4404_v7 = vld [vmem:[%s6654_s1 + $0x22c] ss:$16 sps:$4 sm:$0xff]  }
  0x19   :  { %v4399_v8 = vld [vmem:[%s6654_s1 + $0x220] ss:$16 sps:$4 sm:$0xff]   ;;  %v4402_v9 = vld [vmem:[%s6654_s1 + $0x228] ss:$16 sps:$4 sm:$0xff]   ;;  %v4407_v10 = vld [vmem:[%s6654_s1 + $0x244] ss:$16 sps:$4 sm:$0xff]  }
  0x1a   :  { %v4410_v11 = vld [vmem:[%s6654_s1 + $0x24c] ss:$16 sps:$4 sm:$0xff]   ;;  %v4405_v12 = vld [vmem:[%s6654_s1 + $0x240] ss:$16 sps:$4 sm:$0xff]   ;;  %v4408_v13 = vld [vmem:[%s6654_s1 + $0x248] ss:$16 sps:$4 sm:$0xff]  }
  0x1b   :  { %1326 = vmatpush1.bf16.msra.mxu0 %v4334_v26  ;;  %1515 = vmatpush1.bf16.msra.mxu1 %v4335_v27  ;;  %v4413_v14 = vld [vmem:[%s6654_s1 + $0x264] ss:$16 sps:$4 sm:$0xff]   ;;  %v4416_v15 = vld [vmem:[%s6654_s1 + $0x26c] ss:$16 sps:$4 sm:$0xff]   ;;  %v4411_v16 = vld [vmem:[%s6654_s1 + $0x260] ss:$16 sps:$4 sm:$0xff]  }
  0x1c   :  { %1327 = vmatprep.subr.bf16.mxu0 %v4336_v28  ;;  %1516 = vmatprep.subr.bf16.mxu1 %v4338_v29  ;;  %v4414_v17 = vld [vmem:[%s6654_s1 + $0x268] ss:$16 sps:$4 sm:$0xff]   ;;  %v4419_v18 = vld [vmem:[%s6654_s1 + $0x284] ss:$16 sps:$4 sm:$0xff]   ;;  %v4422_v20 = vld [vmem:[%s6654_s1 + $0x28c] ss:$16 sps:$4 sm:$0xff]  }
  0x1d   :  { %v4465_v19 = vld [vmem:[%s6655_s0 + $0x34] ss:$24 sps:$4 sm:$0xff]   ;;  %v4417_v21 = vld [vmem:[%s6654_s1 + $0x280] ss:$16 sps:$4 sm:$0xff]   ;;  %v4420_v22 = vld [vmem:[%s6654_s1 + $0x288] ss:$16 sps:$4 sm:$0xff]  }
  0x1e   :  { %v4473_v23 = vld [vmem:[%s6655_s0 + $0x30] ss:$24 sps:$4 sm:$0xff]   ;;  %v4425_v24 = vld [vmem:[%s6654_s1 + $0x2a4] ss:$16 sps:$4 sm:$0xff]   ;;  %v4428_v25 = vld [vmem:[%s6654_s1 + $0x2ac] ss:$16 sps:$4 sm:$0xff]  }
  0x1f   :  { %1328 = vmatpush1.bf16.msra.mxu0 %v4340_v30  ;;  %1517 = vmatpush1.bf16.msra.mxu1 %v4341_v31  ;;  %v4423_v26 = vld [vmem:[%s6654_s1 + $0x2a0] ss:$16 sps:$4 sm:$0xff]   ;;  %v4480_v27 = vld [vmem:[%s6655_s0 + $0x64] ss:$24 sps:$4 sm:$0xff]   ;;  %v4426_v28 = vld [vmem:[%s6654_s1 + $0x2a8] ss:$16 sps:$4 sm:$0xff]  }
  0x20   :  { %1329 = vmatprep.subr.bf16.mxu0 %v4342_v32  ;;  %1518 = vmatprep.subr.bf16.mxu1 %v4344_v33  ;;  %v4431_v29 = vld [vmem:[%s6654_s1 + $0x2c4] ss:$16 sps:$4 sm:$0xff]   ;;  %v4434_v30 = vld [vmem:[%s6654_s1 + $0x2cc] ss:$16 sps:$4 sm:$0xff]   ;;  %v4488_v31 = vld [vmem:[%s6655_s0 + $0x60] ss:$24 sps:$4 sm:$0xff]  }
  0x21   :  { %v4429_v32 = vld [vmem:[%s6654_s1 + $0x2c0] ss:$16 sps:$4 sm:$0xff]   ;;  %v4432_v33 = vld [vmem:[%s6654_s1 + $0x2c8] ss:$16 sps:$4 sm:$0xff]   ;;  %v4458_v48 = vld [vmem:[%s6654_s1 + $0x34c] ss:$16 sps:$4 sm:$0xff]  }
  0x23   :  { %1330 = vmatpush1.bf16.msra.mxu0 %v4346_v34  ;;  %1519 = vmatpush1.bf16.msra.mxu1 %v4347_v35  ;;  %v4437_v34 = vld [vmem:[%s6654_s1 + $0x2e4] ss:$16 sps:$4 sm:$0xff]   ;;  %v4440_v35 = vld [vmem:[%s6654_s1 + $0x2ec] ss:$16 sps:$4 sm:$0xff]  }
  0x24   :  { %1331 = vmatprep.subr.bf16.mxu0 %v4348_v36  ;;  %1520 = vmatprep.subr.bf16.mxu1 %v4350_v37  ;;  %v4497_v36 = vld [vmem:[%s6655_s0 + $0xc] ss:$24 sps:$4 sm:$0xff]   ;;  %v4435_v37 = vld [vmem:[%s6654_s1 + $0x2e0] ss:$16 sps:$4 sm:$0xff]  }
  0x27   :  { %1332 = vmatpush1.bf16.msra.mxu0 %v4352_v38  ;;  %1521 = vmatpush1.bf16.msra.mxu1 %v4353_v39  ;;  %v4438_v38 = vld [vmem:[%s6654_s1 + $0x2e8] ss:$16 sps:$4 sm:$0xff]   ;;  %v4443_v39 = vld [vmem:[%s6654_s1 + $0x304] ss:$16 sps:$4 sm:$0xff]  }
  0x28   :  { %1333 = vmatprep.subr.bf16.mxu0 %v4354_v40  ;;  %1522 = vmatprep.subr.bf16.mxu1 %v4356_v41  ;;  %v4446_v40 = vld [vmem:[%s6654_s1 + $0x30c] ss:$16 sps:$4 sm:$0xff]   ;;  %v4441_v41 = vld [vmem:[%s6654_s1 + $0x300] ss:$16 sps:$4 sm:$0xff]  }
  0x2b   :  { %1334 = vmatpush1.bf16.msra.mxu0 %v4358_v42  ;;  %1523 = vmatpush1.bf16.msra.mxu1 %v4359_v43  ;;  %v4444_v42 = vld [vmem:[%s6654_s1 + $0x308] ss:$16 sps:$4 sm:$0xff]   ;;  %v4449_v43 = vld [vmem:[%s6654_s1 + $0x324] ss:$16 sps:$4 sm:$0xff]  }
  0x2c   :  { %1335 = vmatprep.subr.bf16.mxu0 %v4360_v44  ;;  %1524 = vmatprep.subr.bf16.mxu1 %v4362_v45  ;;  %v4452_v44 = vld [vmem:[%s6654_s1 + $0x32c] ss:$16 sps:$4 sm:$0xff]   ;;  %v4447_v45 = vld [vmem:[%s6654_s1 + $0x320] ss:$16 sps:$4 sm:$0xff]  }
  0x2f   :  { %1336 = vmatpush1.bf16.msra.mxu0 %v4364_v46  ;;  %1525 = vmatpush1.bf16.msra.mxu1 %v4365_v47  ;;  %v4450_v46 = vld [vmem:[%s6654_s1 + $0x328] ss:$16 sps:$4 sm:$0xff]   ;;  %v4455_v47 = vld [vmem:[%s6654_s1 + $0x344] ss:$16 sps:$4 sm:$0xff]  }
  0x30   :  { %1337 = vmatprep.subr.bf16.mxu0 %v4366_v49  ;;  %1526 = vmatprep.subr.bf16.mxu1 %v4368_v50  ;;  %v4453_v49 = vld [vmem:[%s6654_s1 + $0x340] ss:$16 sps:$4 sm:$0xff]   ;;  %v4456_v50 = vld [vmem:[%s6654_s1 + $0x348] ss:$16 sps:$4 sm:$0xff]  }
  0x33   :  { %1338 = vmatpush1.bf16.msra.mxu0 %v4370_v51  ;;  %1527 = vmatpush1.bf16.msra.mxu1 %v4371_v52  ;;  %v4461_v51 = vld [vmem:[%s6654_s1 + $0x364] ss:$16 sps:$4 sm:$0xff]   ;;  %v4464_v52 = vld [vmem:[%s6654_s1 + $0x36c] ss:$16 sps:$4 sm:$0xff]  }
  0x34   :  { %1339 = vmatprep.subr.bf16.mxu0 %v4372_v53  ;;  %1528 = vmatprep.subr.bf16.mxu1 %v4374_v54  ;;  %v4459_v53 = vld [vmem:[%s6654_s1 + $0x360] ss:$16 sps:$4 sm:$0xff]   ;;  %v4462_v54 = vld [vmem:[%s6654_s1 + $0x368] ss:$16 sps:$4 sm:$0xff]  }
  0x37   :  { %1340 = vmatpush1.bf16.msra.mxu0 %v4376_v55  ;;  %1529 = vmatpush1.bf16.msra.mxu1 %v4377_v56  ;;  %v4469_v55 = vld [vmem:[%s6654_s1 + $0x384] ss:$16 sps:$4 sm:$0xff]   ;;  %v4472_v56 = vld [vmem:[%s6654_s1 + $0x38c] ss:$16 sps:$4 sm:$0xff]  }
  0x38   :  { %1341 = vmatprep.subr.bf16.mxu0 %v4378_v57  ;;  %1530 = vmatprep.subr.bf16.mxu1 %v4380_v58  ;;  %v4467_v57 = vld [vmem:[%s6654_s1 + $0x380] ss:$16 sps:$4 sm:$0xff]   ;;  %v4470_v58 = vld [vmem:[%s6654_s1 + $0x388] ss:$16 sps:$4 sm:$0xff]  }
  0x3b   :  { %1342 = vmatpush1.bf16.msra.mxu0 %v4382_v59  ;;  %1531 = vmatpush1.bf16.msra.mxu1 %v4383_v60  ;;  %v4476_v59 = vld [vmem:[%s6654_s1 + $0x3a4] ss:$16 sps:$4 sm:$0xff]   ;;  %v4479_v60 = vld [vmem:[%s6654_s1 + $0x3ac] ss:$16 sps:$4 sm:$0xff]  }
  0x3c   :  { %1343 = vmatprep.subr.bf16.mxu0 %v4384_v61  ;;  %1532 = vmatprep.subr.bf16.mxu1 %v4386_v62  ;;  %v4474_v61 = vld [vmem:[%s6654_s1 + $0x3a0] ss:$16 sps:$4 sm:$0xff]   ;;  %v4477_v62 = vld [vmem:[%s6654_s1 + $0x3a8] ss:$16 sps:$4 sm:$0xff]  }
  0x3f   :  { %1344 = vmatpush1.bf16.msra.mxu0 %v4388_v63  ;;  %1533 = vmatpush1.bf16.msra.mxu1 %v4389_v0  ;;  %v4484_v63 = vld [vmem:[%s6654_s1 + $0x3c4] ss:$16 sps:$4 sm:$0xff]   ;;  %v4487_v0 = vld [vmem:[%s6654_s1 + $0x3cc] ss:$16 sps:$4 sm:$0xff]  }
  0x40   :  { %1376 = vmatprep.subr.bf16.mxu0 %v4395_v1  ;;  %1565 = vmatprep.subr.bf16.mxu1 %v4398_v2  ;;  %v4482_v1 = vld [vmem:[%s6654_s1 + $0x3c0] ss:$16 sps:$4 sm:$0xff]   ;;  %v4485_v2 = vld [vmem:[%s6654_s1 + $0x3c8] ss:$16 sps:$4 sm:$0xff]  }
  0x42   :  { %1346 = vmatmul.mubr.bf16.vlgmr.msra.gmra.mrb[0].mxu0 %v4390_v3  ;;  %1535 = vmatmul.mubr.bf16.vlgmr.msra.gmra.mrb[0].mxu1 %v4390_v3  ;;  %v4491_v3 = vld [vmem:[%s6654_s1 + $0x3e4] ss:$16 sps:$4 sm:$0xff]  }
  0x43   :  { %1377 = vmatpush1.bf16.msra.mxu0 %v4393_v4  ;;  %1566 = vmatpush1.bf16.msra.mxu1 %v4396_v5  ;;  %v4494_v4 = vld [vmem:[%s6654_s1 + $0x3ec] ss:$16 sps:$4 sm:$0xff]   ;;  %v4489_v5 = vld [vmem:[%s6654_s1 + $0x3e0] ss:$16 sps:$4 sm:$0xff]  }
  0x44   :  { %1378 = vmatprep.subr.bf16.mxu0 %v4401_v6  ;;  %1567 = vmatprep.subr.bf16.mxu1 %v4404_v7  ;;  %v4492_v6 = vld [vmem:[%s6654_s1 + $0x3e8] ss:$16 sps:$4 sm:$0xff]   ;;  %v4500_v7 = vld [vmem:[%s6654_s1 + $0x404] ss:$16 sps:$4 sm:$0xff]  }
  0x45   :  { %1355 = vmatprep.mubr.bf16.mxu0 %v4465_v19  ;;  %1544 = vmatprep.mubr.bf16.mxu1 %v4465_v19  ;;  %v4510_v19 = vld [vmem:[%s6654_s1 + $0x440] ss:$16 sps:$4 sm:$0xff]  }
  0x47   :  { %1379 = vmatpush1.bf16.msra.mxu0 %v4399_v8  ;;  %1568 = vmatpush1.bf16.msra.mxu1 %v4402_v9  ;;  %v4503_v8 = vld [vmem:[%s6654_s1 + $0x40c] ss:$16 sps:$4 sm:$0xff]   ;;  %v4495_v9 = vld [vmem:[%s6655_s0 + $0x8] ss:$24 sps:$4 sm:$0xff]  }
  0x48   :  { %1380 = vmatprep.subr.bf16.mxu0 %v4407_v10  ;;  %1569 = vmatprep.subr.bf16.mxu1 %v4410_v11  ;;  %v4498_v10 = vld [vmem:[%s6654_s1 + $0x400] ss:$16 sps:$4 sm:$0xff]   ;;  %v4501_v11 = vld [vmem:[%s6654_s1 + $0x408] ss:$16 sps:$4 sm:$0xff]  }
  0x4a   :  { %1356 = vmatmul.mubr.bf16.gmra.mrb[4].mxu0 %v4473_v23  ;;  %1545 = vmatmul.mubr.bf16.gmra.mrb[4].mxu1 %v4473_v23  ;;  %v4521_v23 = vld [vmem:[%s6654_s1 + $0x46c] ss:$16 sps:$4 sm:$0xff]  }
  0x4b   :  { %1381 = vmatpush1.bf16.msra.mxu0 %v4405_v12  ;;  %1570 = vmatpush1.bf16.msra.mxu1 %v4408_v13  ;;  %v4506_v12 = vld [vmem:[%s6654_s1 + $0x424] ss:$16 sps:$4 sm:$0xff]   ;;  %v4509_v13 = vld [vmem:[%s6654_s1 + $0x42c] ss:$16 sps:$4 sm:$0xff]  }
  0x4c   :  { %1382 = vmatprep.subr.bf16.mxu0 %v4413_v14  ;;  %1571 = vmatprep.subr.bf16.mxu1 %v4416_v15  ;;  %v4570_v14 = vld [vmem:[%s6655_s0 + $0x3c] ss:$24 sps:$4 sm:$0xff]   ;;  %v4504_v15 = vld [vmem:[%s6654_s1 + $0x420] ss:$16 sps:$4 sm:$0xff]  }
  0x4d   :  { %1365 = vmatprep.mubr.bf16.mxu0 %v4480_v27  ;;  %1554 = vmatprep.mubr.bf16.mxu1 %v4480_v27  ;;  %v4524_v27 = vld [vmem:[%s6654_s1 + $0x484] ss:$16 sps:$4 sm:$0xff]  }
  0x4f   :  { %1383 = vmatpush1.bf16.msra.mxu0 %v4411_v16  ;;  %1572 = vmatpush1.bf16.msra.mxu1 %v4414_v17  ;;  %v4507_v16 = vld [vmem:[%s6654_s1 + $0x428] ss:$16 sps:$4 sm:$0xff]   ;;  %v4512_v17 = vld [vmem:[%s6654_s1 + $0x444] ss:$16 sps:$4 sm:$0xff]  }
  0x50   :  { %1384 = vmatprep.subr.bf16.mxu0 %v4419_v18  ;;  %1573 = vmatprep.subr.bf16.mxu1 %v4422_v20  ;;  %v4515_v18 = vld [vmem:[%s6654_s1 + $0x44c] ss:$16 sps:$4 sm:$0xff]   ;;  %v4513_v20 = vld [vmem:[%s6654_s1 + $0x448] ss:$16 sps:$4 sm:$0xff]  }
  0x52   :  { %1366 = vmatmul.mubr.bf16.gmra.mrb[8].mxu0 %v4488_v31  ;;  %1555 = vmatmul.mubr.bf16.gmra.mrb[8].mxu1 %v4488_v31  ;;  %v4587_v31 = vld [vmem:[%s6655_s0 + $0x68] ss:$24 sps:$4 sm:$0xff]  }
  0x53   :  { %1385 = vmatpush1.bf16.msra.mxu0 %v4417_v21  ;;  %1574 = vmatpush1.bf16.msra.mxu1 %v4420_v22  ;;  %v4572_v21 = vld [vmem:[%s6655_s0 + $0x38] ss:$24 sps:$4 sm:$0xff]   ;;  %v4518_v22 = vld [vmem:[%s6654_s1 + $0x464] ss:$16 sps:$4 sm:$0xff]  }
  0x54   :  { %1386 = vmatprep.subr.bf16.mxu0 %v4425_v24  ;;  %1575 = vmatprep.subr.bf16.mxu1 %v4428_v25  ;;  %v4585_v24 = vld [vmem:[%s6655_s0 + $0x6c] ss:$24 sps:$4 sm:$0xff]   ;;  %v4516_v25 = vld [vmem:[%s6654_s1 + $0x460] ss:$16 sps:$4 sm:$0xff]  }
  0x55   :  { %1408 = vmatprep.mubr.bf16.mxu0 %v4497_v36  ;;  %1597 = vmatprep.mubr.bf16.mxu1 %v4497_v36  ;;  %v4531_v36 = vld [vmem:[%s6654_s1 + $0x4a8] ss:$16 sps:$4 sm:$0xff]  }
  0x57   :  { %1387 = vmatpush1.bf16.msra.mxu0 %v4423_v26  ;;  %1576 = vmatpush1.bf16.msra.mxu1 %v4426_v28  ;;  %v4519_v26 = vld [vmem:[%s6654_s1 + $0x468] ss:$16 sps:$4 sm:$0xff]   ;;  %v4527_v28 = vld [vmem:[%s6654_s1 + $0x48c] ss:$16 sps:$4 sm:$0xff]  }
  0x58   :  { %1388 = vmatprep.subr.bf16.mxu0 %v4431_v29  ;;  %1577 = vmatprep.subr.bf16.mxu1 %v4434_v30  ;;  %v4522_v29 = vld [vmem:[%s6654_s1 + $0x480] ss:$16 sps:$4 sm:$0xff]   ;;  %v4525_v30 = vld [vmem:[%s6654_s1 + $0x488] ss:$16 sps:$4 sm:$0xff]  }
  0x5b   :  { %1389 = vmatpush1.bf16.msra.mxu0 %v4429_v32  ;;  %1578 = vmatpush1.bf16.msra.mxu1 %v4432_v33  ;;  %v4530_v32 = vld [vmem:[%s6654_s1 + $0x4a4] ss:$16 sps:$4 sm:$0xff]   ;;  %v4533_v33 = vld [vmem:[%s6654_s1 + $0x4ac] ss:$16 sps:$4 sm:$0xff]  }
  0x5c   :  { %1390 = vmatprep.subr.bf16.mxu0 %v4437_v34  ;;  %1579 = vmatprep.subr.bf16.mxu1 %v4440_v35  ;;  %v4602_v34 = vld [vmem:[%s6655_s0 + $0x14] ss:$24 sps:$4 sm:$0xff]   ;;  %v4528_v35 = vld [vmem:[%s6654_s1 + $0x4a0] ss:$16 sps:$4 sm:$0xff]  }
  0x5f   :  { %1391 = vmatpush1.bf16.msra.mxu0 %v4435_v37  ;;  %1580 = vmatpush1.bf16.msra.mxu1 %v4438_v38  ;;  %v4536_v37 = vld [vmem:[%s6654_s1 + $0x4c4] ss:$16 sps:$4 sm:$0xff]   ;;  %v4539_v38 = vld [vmem:[%s6654_s1 + $0x4cc] ss:$16 sps:$4 sm:$0xff]  }
  0x60   :  { %1392 = vmatprep.subr.bf16.mxu0 %v4443_v39  ;;  %1581 = vmatprep.subr.bf16.mxu1 %v4446_v40  ;;  %v4534_v39 = vld [vmem:[%s6654_s1 + $0x4c0] ss:$16 sps:$4 sm:$0xff]   ;;  %v4537_v40 = vld [vmem:[%s6654_s1 + $0x4c8] ss:$16 sps:$4 sm:$0xff]  }
  0x63   :  { %1393 = vmatpush1.bf16.msra.mxu0 %v4441_v41  ;;  %1582 = vmatpush1.bf16.msra.mxu1 %v4444_v42  ;;  %v4542_v41 = vld [vmem:[%s6654_s1 + $0x4e4] ss:$16 sps:$4 sm:$0xff]   ;;  %v4545_v42 = vld [vmem:[%s6654_s1 + $0x4ec] ss:$16 sps:$4 sm:$0xff]  }
  0x64   :  { %1394 = vmatprep.subr.bf16.mxu0 %v4449_v43  ;;  %1583 = vmatprep.subr.bf16.mxu1 %v4452_v44  ;;  %v4540_v43 = vld [vmem:[%s6654_s1 + $0x4e0] ss:$16 sps:$4 sm:$0xff]   ;;  %v4543_v44 = vld [vmem:[%s6654_s1 + $0x4e8] ss:$16 sps:$4 sm:$0xff]  }
  0x67   :  { %1395 = vmatpush1.bf16.msra.mxu0 %v4447_v45  ;;  %1584 = vmatpush1.bf16.msra.mxu1 %v4450_v46  ;;  %v4548_v45 = vld [vmem:[%s6654_s1 + $0x504] ss:$16 sps:$4 sm:$0xff]   ;;  %v4551_v46 = vld [vmem:[%s6654_s1 + $0x50c] ss:$16 sps:$4 sm:$0xff]  }
  0x68   :  { %1396 = vmatprep.subr.bf16.mxu0 %v4455_v47  ;;  %1585 = vmatprep.subr.bf16.mxu1 %v4458_v48  ;;  %v4546_v47 = vld [vmem:[%s6654_s1 + $0x500] ss:$16 sps:$4 sm:$0xff]   ;;  %v4549_v48 = vld [vmem:[%s6654_s1 + $0x508] ss:$16 sps:$4 sm:$0xff]  }
  0x6b   :  { %1397 = vmatpush1.bf16.msra.mxu0 %v4453_v49  ;;  %1586 = vmatpush1.bf16.msra.mxu1 %v4456_v50  ;;  %v4554_v49 = vld [vmem:[%s6654_s1 + $0x524] ss:$16 sps:$4 sm:$0xff]   ;;  %v4557_v50 = vld [vmem:[%s6654_s1 + $0x52c] ss:$16 sps:$4 sm:$0xff]  }
  0x6c   :  { %1398 = vmatprep.subr.bf16.mxu0 %v4461_v51  ;;  %1587 = vmatprep.subr.bf16.mxu1 %v4464_v52  ;;  %v4552_v51 = vld [vmem:[%s6654_s1 + $0x520] ss:$16 sps:$4 sm:$0xff]   ;;  %v4555_v52 = vld [vmem:[%s6654_s1 + $0x528] ss:$16 sps:$4 sm:$0xff]  }
  0x6f   :  { %1399 = vmatpush1.bf16.msra.mxu0 %v4459_v53  ;;  %1588 = vmatpush1.bf16.msra.mxu1 %v4462_v54  ;;  %v4560_v53 = vld [vmem:[%s6654_s1 + $0x544] ss:$16 sps:$4 sm:$0xff]   ;;  %v4563_v54 = vld [vmem:[%s6654_s1 + $0x54c] ss:$16 sps:$4 sm:$0xff]  }
  0x70   :  { %1400 = vmatprep.subr.bf16.mxu0 %v4469_v55  ;;  %1589 = vmatprep.subr.bf16.mxu1 %v4472_v56  ;;  %v4558_v55 = vld [vmem:[%s6654_s1 + $0x540] ss:$16 sps:$4 sm:$0xff]   ;;  %v4561_v56 = vld [vmem:[%s6654_s1 + $0x548] ss:$16 sps:$4 sm:$0xff]  }
  0x73   :  { %1401 = vmatpush1.bf16.msra.mxu0 %v4467_v57  ;;  %1590 = vmatpush1.bf16.msra.mxu1 %v4470_v58  ;;  %v4566_v57 = vld [vmem:[%s6654_s1 + $0x564] ss:$16 sps:$4 sm:$0xff]   ;;  %v4569_v58 = vld [vmem:[%s6654_s1 + $0x56c] ss:$16 sps:$4 sm:$0xff]  }
  0x74   :  { %1402 = vmatprep.subr.bf16.mxu0 %v4476_v59  ;;  %1591 = vmatprep.subr.bf16.mxu1 %v4479_v60  ;;  %v4564_v59 = vld [vmem:[%s6654_s1 + $0x560] ss:$16 sps:$4 sm:$0xff]   ;;  %v4567_v60 = vld [vmem:[%s6654_s1 + $0x568] ss:$16 sps:$4 sm:$0xff]  }
  0x77   :  { %1403 = vmatpush1.bf16.msra.mxu0 %v4474_v61  ;;  %1592 = vmatpush1.bf16.msra.mxu1 %v4477_v62  ;;  %v4575_v61 = vld [vmem:[%s6654_s1 + $0x584] ss:$16 sps:$4 sm:$0xff]   ;;  %v4578_v62 = vld [vmem:[%s6654_s1 + $0x58c] ss:$16 sps:$4 sm:$0xff]  }
  0x78   :  { %1404 = vmatprep.subr.bf16.mxu0 %v4484_v63  ;;  %1593 = vmatprep.subr.bf16.mxu1 %v4487_v0  ;;  %v4573_v63 = vld [vmem:[%s6654_s1 + $0x580] ss:$16 sps:$4 sm:$0xff]   ;;  %v4576_v0 = vld [vmem:[%s6654_s1 + $0x588] ss:$16 sps:$4 sm:$0xff]  }
  0x7b   :  { %1405 = vmatpush1.bf16.msra.mxu0 %v4482_v1  ;;  %1594 = vmatpush1.bf16.msra.mxu1 %v4485_v2  ;;  %v4581_v1 = vld [vmem:[%s6654_s1 + $0x5a4] ss:$16 sps:$4 sm:$0xff]   ;;  %v4584_v2 = vld [vmem:[%s6654_s1 + $0x5ac] ss:$16 sps:$4 sm:$0xff]  }
  0x7c   :  { %1406 = vmatprep.subr.bf16.mxu0 %v4491_v3  ;;  %1595 = vmatprep.subr.bf16.mxu1 %v4494_v4  ;;  %v4579_v3 = vld [vmem:[%s6654_s1 + $0x5a0] ss:$16 sps:$4 sm:$0xff]   ;;  %v4582_v4 = vld [vmem:[%s6654_s1 + $0x5a8] ss:$16 sps:$4 sm:$0xff]  }
  0x7f   :  { %1407 = vmatpush1.bf16.msra.mxu0 %v4489_v5  ;;  %1596 = vmatpush1.bf16.msra.mxu1 %v4492_v6  ;;  %v4590_v5 = vld [vmem:[%s6654_s1 + $0x5c4] ss:$16 sps:$4 sm:$0xff]   ;;  %v4593_v6 = vld [vmem:[%s6654_s1 + $0x5cc] ss:$16 sps:$4 sm:$0xff]  }
  0x80   :  { %1439 = vmatprep.subr.bf16.mxu0 %v4500_v7  ;;  %1628 = vmatprep.subr.bf16.mxu1 %v4503_v8  ;;  %v4588_v7 = vld [vmem:[%s6654_s1 + $0x5c0] ss:$16 sps:$4 sm:$0xff]   ;;  %v4591_v8 = vld [vmem:[%s6654_s1 + $0x5c8] ss:$16 sps:$4 sm:$0xff]  }
  0x82   :  { %1409 = vmatmul.mubr.bf16.vlgmr.msra.gmra.mrb[0].mxu0 %v4495_v9  ;;  %1598 = vmatmul.mubr.bf16.vlgmr.msra.gmra.mrb[0].mxu1 %v4495_v9  ;;  %v4596_v9 = vld [vmem:[%s6654_s1 + $0x5e4] ss:$16 sps:$4 sm:$0xff]  }
  0x83   :  { %1440 = vmatpush1.bf16.msra.mxu0 %v4498_v10  ;;  %1629 = vmatpush1.bf16.msra.mxu1 %v4501_v11  ;;  %v4599_v10 = vld [vmem:[%s6654_s1 + $0x5ec] ss:$16 sps:$4 sm:$0xff]   ;;  %v4594_v11 = vld [vmem:[%s6654_s1 + $0x5e0] ss:$16 sps:$4 sm:$0xff]  }
  0x84   :  { %1441 = vmatprep.subr.bf16.mxu0 %v4506_v12  ;;  %1630 = vmatprep.subr.bf16.mxu1 %v4509_v13  ;;  %v4597_v12 = vld [vmem:[%s6654_s1 + $0x5e8] ss:$16 sps:$4 sm:$0xff]   ;;  %v4611_v13 = vld [vmem:[%s6656_s5 + $0x4] ss:$8 sps:$4 sm:$0xff]  }
  0x85   :  { %1418 = vmatprep.mubr.bf16.mxu0 %v4570_v14  ;;  %1607 = vmatprep.mubr.bf16.mxu1 %v4570_v14  ;;  %v4614_v14 = vld [vmem:[%s6657_s3 + $0x4] ss:$16 sps:$4 sm:$0xff]  }
  0x87   :  { %1442 = vmatpush1.bf16.msra.mxu0 %v4504_v15  ;;  %1631 = vmatpush1.bf16.msra.mxu1 %v4507_v16  ;;  %v4600_v15 = vld [vmem:[%s6655_s0 + $0x10] ss:$24 sps:$4 sm:$0xff]   ;;  %v4603_v16 = vld [vmem:[%s6655_s0 + $0x44] ss:$24 sps:$4 sm:$0xff]  }
  0x88   :  { %1443 = vmatprep.subr.bf16.mxu0 %v4512_v17  ;;  %1632 = vmatprep.subr.bf16.mxu1 %v4515_v18  ;;  %v4609_v17 = vld [vmem:[%s6656_s5] ss:$8 sps:$4 sm:$0xff]  }
  0x89   :  { %v4612_v18 = vld [vmem:[%s6657_s3] ss:$16 sps:$4 sm:$0xff]  }
  0x8a   :  { %1419 = vmatmul.mubr.bf16.gmra.mrb[4].mxu0 %v4572_v21  ;;  %1608 = vmatmul.mubr.bf16.gmra.mrb[4].mxu1 %v4572_v21  ;;  %v4615_v21 = vld [vmem:[%s6656_s5 + $0x10] ss:$8 sps:$4 sm:$0xff]  }
  0x8b   :  { %1444 = vmatpush1.bf16.msra.mxu0 %v4510_v19  ;;  %1633 = vmatpush1.bf16.msra.mxu1 %v4513_v20  ;;  %v4617_v19 = vld [vmem:[%s6656_s5 + $0x14] ss:$8 sps:$4 sm:$0xff]  }
  0x8c   :  { %1445 = vmatprep.subr.bf16.mxu0 %v4518_v22  ;;  %1634 = vmatprep.subr.bf16.mxu1 %v4521_v23  ;;  %v4620_v20 = vld [vmem:[%s6657_s3 + $0x24] ss:$16 sps:$4 sm:$0xff]   ;;  %v4618_v22 = vld [vmem:[%s6657_s3 + $0x20] ss:$16 sps:$4 sm:$0xff]  }
  0x8d   :  { %1428 = vmatprep.mubr.bf16.mxu0 %v4585_v24  ;;  %1617 = vmatprep.mubr.bf16.mxu1 %v4585_v24  ;;  %v4623_v23 = vld [vmem:[%s6656_s5 + $0x24] ss:$8 sps:$4 sm:$0xff]  }
  0x8e   :  { %v4626_v24 = vld [vmem:[%s6657_s3 + $0x44] ss:$16 sps:$4 sm:$0xff]  }
  0x8f   :  { %1446 = vmatpush1.bf16.msra.mxu0 %v4516_v25  ;;  %1635 = vmatpush1.bf16.msra.mxu1 %v4519_v26  ;;  %v4605_v25 = vld [vmem:[%s6655_s0 + $0x40] ss:$24 sps:$4 sm:$0xff]   ;;  %v4606_v26 = vld [vmem:[%s6655_s0 + $0x74] ss:$24 sps:$4 sm:$0xff]  }
  0x90   :  { %1447 = vmatprep.subr.bf16.mxu0 %v4524_v27  ;;  %1636 = vmatprep.subr.bf16.mxu1 %v4527_v28  ;;  %v4621_v27 = vld [vmem:[%s6656_s5 + $0x20] ss:$8 sps:$4 sm:$0xff]  }
  0x91   :  { %v4624_v28 = vld [vmem:[%s6657_s3 + $0x40] ss:$16 sps:$4 sm:$0xff]  }
  0x92   :  { %1429 = vmatmul.mubr.bf16.gmra.mrb[8].mxu0 %v4587_v31  ;;  %1618 = vmatmul.mubr.bf16.gmra.mrb[8].mxu1 %v4587_v31  ;;  %v4627_v31 = vld [vmem:[%s6656_s5 + $0x30] ss:$8 sps:$4 sm:$0xff]  }
  0x93   :  { %1448 = vmatpush1.bf16.msra.mxu0 %v4522_v29  ;;  %1637 = vmatpush1.bf16.msra.mxu1 %v4525_v30  ;;  %v4629_v29 = vld [vmem:[%s6656_s5 + $0x34] ss:$8 sps:$4 sm:$0xff]  }
  0x94   :  { %1449 = vmatprep.subr.bf16.mxu0 %v4530_v32  ;;  %1638 = vmatprep.subr.bf16.mxu1 %v4533_v33  ;;  %v4632_v30 = vld [vmem:[%s6657_s3 + $0x64] ss:$16 sps:$4 sm:$0xff]   ;;  %v4630_v32 = vld [vmem:[%s6657_s3 + $0x60] ss:$16 sps:$4 sm:$0xff]  }
  0x95   :  { %1471 = vmatprep.mubr.bf16.mxu0 %v4602_v34  ;;  %1660 = vmatprep.mubr.bf16.mxu1 %v4602_v34  ;;  %v4635_v33 = vld [vmem:[%s6656_s5 + $0x44] ss:$8 sps:$4 sm:$0xff]  }
  0x96   :  { %v4638_v34 = vld [vmem:[%s6657_s3 + $0x84] ss:$16 sps:$4 sm:$0xff]  }
  0x97   :  { %1450 = vmatpush1.bf16.msra.mxu0 %v4528_v35  ;;  %1639 = vmatpush1.bf16.msra.mxu1 %v4531_v36  ;;  %v4608_v35 = vld [vmem:[%s6655_s0 + $0x70] ss:$24 sps:$4 sm:$0xff]  }
  0x98   :  { %1451 = vmatprep.subr.bf16.mxu0 %v4536_v37  ;;  %1640 = vmatprep.subr.bf16.mxu1 %v4539_v38  ;;  %v4633_v36 = vld [vmem:[%s6656_s5 + $0x40] ss:$8 sps:$4 sm:$0xff]   ;;  %v4641_v38 = vld [vmem:[%s6656_s5 + $0x54] ss:$8 sps:$4 sm:$0xff]  }
  0x99   :  { %v4636_v37 = vld [vmem:[%s6657_s3 + $0x80] ss:$16 sps:$4 sm:$0xff]  }
  0x9b   :  { %1452 = vmatpush1.bf16.msra.mxu0 %v4534_v39  ;;  %1641 = vmatpush1.bf16.msra.mxu1 %v4537_v40  ;;  %v4644_v39 = vld [vmem:[%s6657_s3 + $0xa4] ss:$16 sps:$4 sm:$0xff]   ;;  %v4639_v40 = vld [vmem:[%s6656_s5 + $0x50] ss:$8 sps:$4 sm:$0xff]  }
  0x9c   :  { %1453 = vmatprep.subr.bf16.mxu0 %v4542_v41  ;;  %1642 = vmatprep.subr.bf16.mxu1 %v4545_v42  ;;  %v4642_v41 = vld [vmem:[%s6657_s3 + $0xa0] ss:$16 sps:$4 sm:$0xff]   ;;  %v4647_v42 = vld [vmem:[%s6656_s5 + $0x64] ss:$8 sps:$4 sm:$0xff]  }
  0x9f   :  { %1454 = vmatpush1.bf16.msra.mxu0 %v4540_v43  ;;  %1643 = vmatpush1.bf16.msra.mxu1 %v4543_v44  ;;  %v4650_v43 = vld [vmem:[%s6657_s3 + $0xc4] ss:$16 sps:$4 sm:$0xff]   ;;  %v4645_v44 = vld [vmem:[%s6656_s5 + $0x60] ss:$8 sps:$4 sm:$0xff]  }
  0xa0   :  { %1455 = vmatprep.subr.bf16.mxu0 %v4548_v45  ;;  %1644 = vmatprep.subr.bf16.mxu1 %v4551_v46  ;;  %v4648_v45 = vld [vmem:[%s6657_s3 + $0xc0] ss:$16 sps:$4 sm:$0xff]   ;;  %v4653_v46 = vld [vmem:[%s6656_s5 + $0x74] ss:$8 sps:$4 sm:$0xff]  }
  0xa3   :  { %1456 = vmatpush1.bf16.msra.mxu0 %v4546_v47  ;;  %1645 = vmatpush1.bf16.msra.mxu1 %v4549_v48  ;;  %v4656_v47 = vld [vmem:[%s6657_s3 + $0xe4] ss:$16 sps:$4 sm:$0xff]   ;;  %v4651_v48 = vld [vmem:[%s6656_s5 + $0x70] ss:$8 sps:$4 sm:$0xff]  }
  0xa4   :  { %1457 = vmatprep.subr.bf16.mxu0 %v4554_v49  ;;  %1646 = vmatprep.subr.bf16.mxu1 %v4557_v50  ;;  %v4654_v49 = vld [vmem:[%s6657_s3 + $0xe0] ss:$16 sps:$4 sm:$0xff]   ;;  %v4659_v50 = vld [vmem:[%s6656_s5 + $0x84] ss:$8 sps:$4 sm:$0xff]  }
  0xa7   :  { %1458 = vmatpush1.bf16.msra.mxu0 %v4552_v51  ;;  %1647 = vmatpush1.bf16.msra.mxu1 %v4555_v52  ;;  %v4662_v51 = vld [vmem:[%s6657_s3 + $0x104] ss:$16 sps:$4 sm:$0xff]   ;;  %v4657_v52 = vld [vmem:[%s6656_s5 + $0x80] ss:$8 sps:$4 sm:$0xff]  }
  0xa8   :  { %1459 = vmatprep.subr.bf16.mxu0 %v4560_v53  ;;  %1648 = vmatprep.subr.bf16.mxu1 %v4563_v54  ;;  %v4660_v53 = vld [vmem:[%s6657_s3 + $0x100] ss:$16 sps:$4 sm:$0xff]   ;;  %v4665_v54 = vld [vmem:[%s6656_s5 + $0x94] ss:$8 sps:$4 sm:$0xff]  }
  0xab   :  { %1460 = vmatpush1.bf16.msra.mxu0 %v4558_v55  ;;  %1649 = vmatpush1.bf16.msra.mxu1 %v4561_v56  ;;  %v4668_v55 = vld [vmem:[%s6657_s3 + $0x124] ss:$16 sps:$4 sm:$0xff]   ;;  %v4663_v56 = vld [vmem:[%s6656_s5 + $0x90] ss:$8 sps:$4 sm:$0xff]  }
  0xac   :  { %1461 = vmatprep.subr.bf16.mxu0 %v4566_v57  ;;  %1650 = vmatprep.subr.bf16.mxu1 %v4569_v58  ;;  %v4666_v57 = vld [vmem:[%s6657_s3 + $0x120] ss:$16 sps:$4 sm:$0xff]   ;;  %v4671_v58 = vld [vmem:[%s6656_s5 + $0xa4] ss:$8 sps:$4 sm:$0xff]  }
  0xaf   :  { %1462 = vmatpush1.bf16.msra.mxu0 %v4564_v59  ;;  %1651 = vmatpush1.bf16.msra.mxu1 %v4567_v60  ;;  %v4674_v59 = vld [vmem:[%s6657_s3 + $0x144] ss:$16 sps:$4 sm:$0xff]   ;;  %v4669_v60 = vld [vmem:[%s6656_s5 + $0xa0] ss:$8 sps:$4 sm:$0xff]  }
  0xb0   :  { %1463 = vmatprep.subr.bf16.mxu0 %v4575_v61  ;;  %1652 = vmatprep.subr.bf16.mxu1 %v4578_v62  ;;  %v4672_v61 = vld [vmem:[%s6657_s3 + $0x140] ss:$16 sps:$4 sm:$0xff]   ;;  %v4677_v62 = vld [vmem:[%s6656_s5 + $0xb4] ss:$8 sps:$4 sm:$0xff]  }
  0xb3   :  { %1464 = vmatpush1.bf16.msra.mxu0 %v4573_v63  ;;  %1653 = vmatpush1.bf16.msra.mxu1 %v4576_v0  ;;  %v4680_v63 = vld [vmem:[%s6657_s3 + $0x164] ss:$16 sps:$4 sm:$0xff]   ;;  %v4675_v0 = vld [vmem:[%s6656_s5 + $0xb0] ss:$8 sps:$4 sm:$0xff]  }
  0xb4   :  { %1465 = vmatprep.subr.bf16.mxu0 %v4581_v1  ;;  %1654 = vmatprep.subr.bf16.mxu1 %v4584_v2  ;;  %v4678_v1 = vld [vmem:[%s6657_s3 + $0x160] ss:$16 sps:$4 sm:$0xff]   ;;  %v4683_v2 = vld [vmem:[%s6656_s5 + $0xc4] ss:$8 sps:$4 sm:$0xff]  }
  0xb7   :  { %1466 = vmatpush1.bf16.msra.mxu0 %v4579_v3  ;;  %1655 = vmatpush1.bf16.msra.mxu1 %v4582_v4  ;;  %v4686_v3 = vld [vmem:[%s6657_s3 + $0x184] ss:$16 sps:$4 sm:$0xff]   ;;  %v4681_v4 = vld [vmem:[%s6656_s5 + $0xc0] ss:$8 sps:$4 sm:$0xff]  }
  0xb8   :  { %1467 = vmatprep.subr.bf16.mxu0 %v4590_v5  ;;  %1656 = vmatprep.subr.bf16.mxu1 %v4593_v6  ;;  %v4684_v5 = vld [vmem:[%s6657_s3 + $0x180] ss:$16 sps:$4 sm:$0xff]   ;;  %v4689_v6 = vld [vmem:[%s6656_s5 + $0xd4] ss:$8 sps:$4 sm:$0xff]  }
  0xbb   :  { %1468 = vmatpush1.bf16.msra.mxu0 %v4588_v7  ;;  %1657 = vmatpush1.bf16.msra.mxu1 %v4591_v8  ;;  %v4692_v7 = vld [vmem:[%s6657_s3 + $0x1a4] ss:$16 sps:$4 sm:$0xff]   ;;  %v4687_v8 = vld [vmem:[%s6656_s5 + $0xd0] ss:$8 sps:$4 sm:$0xff]  }
  0xbc   :  { %1469 = vmatprep.subr.bf16.mxu0 %v4596_v9  ;;  %1658 = vmatprep.subr.bf16.mxu1 %v4599_v10  ;;  %v4690_v9 = vld [vmem:[%s6657_s3 + $0x1a0] ss:$16 sps:$4 sm:$0xff]   ;;  %v4695_v10 = vld [vmem:[%s6656_s5 + $0xe4] ss:$8 sps:$4 sm:$0xff]  }
  0xbf   :  { %1470 = vmatpush1.bf16.msra.mxu0 %v4594_v11  ;;  %1659 = vmatpush1.bf16.msra.mxu1 %v4597_v12  ;;  %v4698_v11 = vld [vmem:[%s6657_s3 + $0x1c4] ss:$16 sps:$4 sm:$0xff]   ;;  %v4693_v12 = vld [vmem:[%s6656_s5 + $0xe0] ss:$8 sps:$4 sm:$0xff]  }
  0xc0   :  { %2169 = vmatprep.subr.bf16.mxu0 %v4611_v13  ;;  %3075 = vmatprep.subr.bf16.mxu1 %v4614_v14  ;;  %v4696_v13 = vld [vmem:[%s6657_s3 + $0x1c0] ss:$16 sps:$4 sm:$0xff]   ;;  %v4701_v14 = vld [vmem:[%s6656_s5 + $0xf4] ss:$8 sps:$4 sm:$0xff]  }
  0xc2   :  { %1472 = vmatmul.mubr.bf16.vlgmr.msra.gmra.mrb[0].mxu0 %v4600_v15  ;;  %1661 = vmatmul.mubr.bf16.vlgmr.msra.gmra.mrb[0].mxu1 %v4600_v15  ;;  %v4704_v15 = vld [vmem:[%s6657_s3 + $0x1e4] ss:$16 sps:$4 sm:$0xff]  }
  0xc3   :  { %1481 = vmatprep.mubr.bf16.mxu0 %v4603_v16  ;;  %1670 = vmatprep.mubr.bf16.mxu1 %v4603_v16  ;;  %v4699_v16 = vld [vmem:[%s6656_s5 + $0xf0] ss:$8 sps:$4 sm:$0xff]  }
  0xc4   :  { %2170 = vmatpush1.bf16.msra.mxu0 %v4609_v17  ;;  %3076 = vmatpush1.bf16.msra.mxu1 %v4612_v18  ;;  %v4702_v17 = vld [vmem:[%s6657_s3 + $0x1e0] ss:$16 sps:$4 sm:$0xff]   ;;  %v4707_v18 = vld [vmem:[%s6656_s5 + $0x104] ss:$8 sps:$4 sm:$0xff]  }
  0xc5   :  { %2171 = vmatprep.subr.bf16.mxu0 %v4617_v19  ;;  %3077 = vmatprep.subr.bf16.mxu1 %v4620_v20  ;;  %v4710_v19 = vld [vmem:[%s6657_s3 + $0x204] ss:$16 sps:$4 sm:$0xff]   ;;  %v243_v20 = vlaneseq }
  0xc8   :  { %2172 = vmatpush1.bf16.msra.mxu0 %v4615_v21  ;;  %3078 = vmatpush1.bf16.msra.mxu1 %v4618_v22  ;;  %v244_v21 = vshrl.u32 %v243_v20, 7 }
  0xc9   :  { %2173 = vmatprep.subr.bf16.mxu0 %v4623_v23  ;;  %3079 = vmatprep.subr.bf16.mxu1 %v4626_v24  ;;  %v241_v23 = vld [vmem:[%s6658_s2] sm:$0xf] }
  0xca   :  { %1482 = vmatmul.mubr.bf16.gmra.mrb[4].mxu0 %v4605_v25  ;;  %1671 = vmatmul.mubr.bf16.gmra.mrb[4].mxu1 %v4605_v25  ;;  %v5847_v22 = vsub.s32 0, %v244_v21  ;;  %v5852_v24 = vsub.s32 1, %v244_v21  ;;  %v253_v25 = vsub.s32 2, %v244_v21 }
  0xcb   :  { %1491 = vmatprep.mubr.bf16.mxu0 %v4606_v26  ;;  %1680 = vmatprep.mubr.bf16.mxu1 %v4606_v26  ;;  %v1691_v26 = vld [vmem:[%s6659_s4] sm:$0xf] }
  0xcc   :  { %2174 = vmatpush1.bf16.msra.mxu0 %v4621_v27  ;;  %3080 = vmatpush1.bf16.msra.mxu1 %v4624_v28  ;;  %v257_v27 = vsub.s32 3, %v244_v21  ;;  %v5858_v28 = vrot.slane %v241_v23, %v5847_v22 }
  0xcd   :  { %2175 = vmatprep.subr.bf16.mxu0 %v4629_v29  ;;  %3081 = vmatprep.subr.bf16.mxu1 %v4632_v30  ;;  %v5861_v29 = vrot.slane %v241_v23, %v5852_v24  ;;  %v5864_v30 = vrot.slane %v1691_v26, %v5847_v22 }
  0xd0   :  { %2176 = vmatpush1.bf16.msra.mxu0 %v4627_v31  ;;  %3082 = vmatpush1.bf16.msra.mxu1 %v4630_v32  ;;  %v5866_v31 = vrot.slane %v241_v23, %v253_v25 }
  0xd1   :  { %2177 = vmatprep.subr.bf16.mxu0 %v4635_v33  ;;  %3083 = vmatprep.subr.bf16.mxu1 %v4638_v34  ;;  %v5869_v34 = vrot.slane %v1691_v26, %v5852_v24 }
  0xd2   :  { %1492 = vmatmul.mubr.bf16.gmra.mrb[8].mxu0 %v4608_v35  ;;  %1681 = vmatmul.mubr.bf16.gmra.mrb[8].mxu1 %v4608_v35  ;;  %v5871_v35 = vrot.slane %v241_v23, %v257_v27  ;;  %v4711_v23 = vld [vmem:[%s6656_s5 + $0x110] ss:$8 sps:$4 sm:$0xff]  }
  0xd4   :  { %2178 = vmatpush1.bf16.msra.mxu0 %v4633_v36  ;;  %3084 = vmatpush1.bf16.msra.mxu1 %v4636_v37 }
  0xd5   :  { %2179 = vmatprep.subr.bf16.mxu0 %v4641_v38  ;;  %3085 = vmatprep.subr.bf16.mxu1 %v4644_v39  ;;  %v5874_v39 = vrot.slane %v1691_v26, %v253_v25  ;;  %v4714_v25 = vld [vmem:[%s6657_s3 + $0x220] ss:$16 sps:$4 sm:$0xff]  }
  0xd8   :  { %2180 = vmatpush1.bf16.msra.mxu0 %v4639_v40  ;;  %3086 = vmatpush1.bf16.msra.mxu1 %v4642_v41 }
  0xd9   :  { %2181 = vmatprep.subr.bf16.mxu0 %v4647_v42  ;;  %3087 = vmatprep.subr.bf16.mxu1 %v4650_v43 }
  0xdc   :  { %2182 = vmatpush1.bf16.msra.mxu0 %v4645_v44  ;;  %3088 = vmatpush1.bf16.msra.mxu1 %v4648_v45 }
  0xdd   :  { %2183 = vmatprep.subr.bf16.mxu0 %v4653_v46  ;;  %3089 = vmatprep.subr.bf16.mxu1 %v4656_v47 }
  0xe0   :  { %2184 = vmatpush1.bf16.msra.mxu0 %v4651_v48  ;;  %3090 = vmatpush1.bf16.msra.mxu1 %v4654_v49 }
  0xe1   :  { %2185 = vmatprep.subr.bf16.mxu0 %v4659_v50  ;;  %3091 = vmatprep.subr.bf16.mxu1 %v4662_v51 }
  0xe4   :  { %2186 = vmatpush1.bf16.msra.mxu0 %v4657_v52  ;;  %3092 = vmatpush1.bf16.msra.mxu1 %v4660_v53 }
  0xe5   :  { %2187 = vmatprep.subr.bf16.mxu0 %v4665_v54  ;;  %3093 = vmatprep.subr.bf16.mxu1 %v4668_v55 }
  0xe8   :  { %2188 = vmatpush1.bf16.msra.mxu0 %v4663_v56  ;;  %3094 = vmatpush1.bf16.msra.mxu1 %v4666_v57  ;;  %v5890_v56 = vrot.slane %v1691_v26, %v257_v27 }
  0xe9   :  { %2189 = vmatprep.subr.bf16.mxu0 %v4671_v58  ;;  %3095 = vmatprep.subr.bf16.mxu1 %v4674_v59 }
  0xec   :  { %2190 = vmatpush1.bf16.msra.mxu0 %v4669_v60  ;;  %3096 = vmatpush1.bf16.msra.mxu1 %v4672_v61  ;;  %v4705_v60 = vld [vmem:[%s6656_s5 + $0x100] ss:$8 sps:$4 sm:$0xff]  }
  0xed   :  { %2191 = vmatprep.subr.bf16.mxu0 %v4677_v62  ;;  %3097 = vmatprep.subr.bf16.mxu1 %v4680_v63  ;;  %v4708_v61 = vld [vmem:[%s6657_s3 + $0x200] ss:$16 sps:$4 sm:$0xff]   ;;  %v4713_v63 = vld [vmem:[%s6656_s5 + $0x114] ss:$8 sps:$4 sm:$0xff]  }
  0xf0   :  { %2192 = vmatpush1.bf16.msra.mxu0 %v4675_v0  ;;  %3098 = vmatpush1.bf16.msra.mxu1 %v4678_v1 }
  0xf1   :  { %2193 = vmatprep.subr.bf16.mxu0 %v4683_v2  ;;  %3099 = vmatprep.subr.bf16.mxu1 %v4686_v3 }
  0xf4   :  { %2194 = vmatpush1.bf16.msra.mxu0 %v4681_v4  ;;  %3100 = vmatpush1.bf16.msra.mxu1 %v4684_v5  ;;  %v4716_v5 = vld [vmem:[%s6657_s3 + $0x224] ss:$16 sps:$4 sm:$0xff]  }
  0xf5   :  { %2195 = vmatprep.subr.bf16.mxu0 %v4689_v6  ;;  %3101 = vmatprep.subr.bf16.mxu1 %v4692_v7 }
  0xf8   :  { %2196 = vmatpush1.bf16.msra.mxu0 %v4687_v8  ;;  %3102 = vmatpush1.bf16.msra.mxu1 %v4690_v9 }
  0xf9   :  { %2197 = vmatprep.subr.bf16.mxu0 %v4695_v10  ;;  %3103 = vmatprep.subr.bf16.mxu1 %v4698_v11 }
  0xfc   :  { %2198 = vmatpush1.bf16.msra.mxu0 %v4693_v12  ;;  %3104 = vmatpush1.bf16.msra.mxu1 %v4696_v13 }
  0xfd   :  { %2199 = vmatprep.subr.bf16.mxu0 %v4701_v14  ;;  %3105 = vmatprep.subr.bf16.mxu1 %v4704_v15 }
 0x100   :  { %2200 = vmatpush1.bf16.msra.mxu0 %v4699_v16  ;;  %3106 = vmatpush1.bf16.msra.mxu1 %v4702_v17 }
 0x101   :  { %2232 = vmatprep.subr.bf16.mxu0 %v4707_v18  ;;  %3138 = vmatprep.subr.bf16.mxu1 %v4710_v19 }
 0x195   :  { %v1473_v32 = vpop.f32.mrb[0].mxu0  ;;  %v1662_v33 = vpop.f32.mrb[0].mxu1 }
 0x196   :  { %v4186_v36 = vadd.f32 %v1473_v32, %v5858_v28  ;;  %v1475_v37 = vpop.f32.mrb[1].mxu0  ;;  %v1664_v38 = vpop.f32.mrb[1].mxu1  ;;  %v4198_v44 = vadd.f32 %v1662_v33, %v5866_v31 }
 0x197   :  { %v4187_v40 = vadd.f32 %v1475_v37, %v5861_v29  ;;  %v1477_v41 = vpop.f32.mrb[2].mxu0  ;;  %v1666_v42 = vpop.f32.mrb[2].mxu1  ;;  %v4199_v50 = vadd.f32 %v1664_v38, %v5871_v35 }
 0x198   :  { %v1713_v43 = vmul.f32 %v4186_v36, %v5864_v30  ;;  %v4188_v45 = vadd.f32 %v1477_v41, %v5858_v28  ;;  %v4200_v46 = vadd.f32 %v1666_v42, %v5866_v31  ;;  %v1479_v47 = vpop.f32.mrb[3].mxu0  ;;  %v1668_v48 = vpop.f32.mrb[3].mxu1  ;;  %v1715_v62 = vmul.f32 %v4198_v44, %v5874_v39  ;;  %v4722_v42 = vld [vmem:[%s6657_s3 + $0x244] ss:$16 sps:$4 sm:$0xff]  }
 0x199   :  { %v1714_v49 = vmul.f32 %v4187_v40, %v5869_v34  ;;  %v4189_v51 = vadd.f32 %v1479_v47, %v5861_v29  ;;  %v4201_v52 = vadd.f32 %v1668_v48, %v5871_v35  ;;  %v1716_v9 = vmul.f32 %v4199_v50, %v5890_v56  ;;  %v4717_v47 = vld [vmem:[%s6656_s5 + $0x120] ss:$8 sps:$4 sm:$0xff]  }
 0x19a   :  { %v1717_v53 = vmul.f32 %v4188_v45, %v5864_v30  ;;  %v5886_v54 = vpack.c.bf16 %v4188_v45, %v4186_v36  ;;  %v5888_v55 = vpack.c.bf16 %v4200_v46, %v4198_v44  ;;  %v1719_v1 = vmul.f32 %v4200_v46, %v5874_v39  ;;  %v4719_v36 = vld [vmem:[%s6656_s5 + $0x124] ss:$8 sps:$4 sm:$0xff]  }
 0x19b   :  { %v1718_v57 = vmul.f32 %v4189_v51, %v5869_v34  ;;  %v5893_v58 = vpack.c.bf16 %v4189_v51, %v4187_v40  ;;  %v5895_v59 = vpack.c.bf16 %v4201_v52, %v4199_v50  ;;  %v1737_v0 = vadd.f32 %v1714_v49, %v1713_v43 }
 0x19c   :  { %v1720_v37 = vmul.f32 %v4201_v52, %v5890_v56 }
 0x19d   :  { %v1742_v2 = vadd.f32 %v1718_v57, %v1717_v53  ;;  %v1483_v3 = vpop.f32.mrb[4].mxu0  ;;  %v1672_v4 = vpop.f32.mrb[4].mxu1  ;;  %2201 = vmatprep.mubr.bf16.mxu0 %v5893_v58  ;;  %3107 = vmatprep.mubr.bf16.mxu1 %v5893_v58  ;;  %v1738_v10 = vadd.f32 %v1737_v0, %v1715_v62 }
 0x19e   :  { %v4190_v6 = vadd.f32 %v1483_v3, %v5858_v28  ;;  %v1485_v7 = vpop.f32.mrb[5].mxu0  ;;  %v1674_v8 = vpop.f32.mrb[5].mxu1  ;;  %2202 = vmatmul.mubr.bf16.vlgmr.msra.gmra.mrb[12].mxu0 %v5886_v54  ;;  %3108 = vmatmul.mubr.bf16.vlgmr.msra.gmra.mrb[12].mxu1 %v5886_v54  ;;  %v4202_v11 = vadd.f32 %v1672_v4, %v5866_v31 }
 0x19f   :  { %v4191_v12 = vadd.f32 %v1485_v7, %v5861_v29  ;;  %2233 = vmatpush1.bf16.msra.mxu0 %v4705_v60  ;;  %3139 = vmatpush1.bf16.msra.mxu1 %v4708_v61  ;;  %v1487_v13 = vpop.f32.mrb[6].mxu0  ;;  %v1676_v14 = vpop.f32.mrb[6].mxu1  ;;  %v1743_v15 = vadd.f32 %v1742_v2, %v1719_v1  ;;  %v4203_v17 = vadd.f32 %v1674_v8, %v5871_v35  ;;  %v4720_v60 = vld [vmem:[%s6657_s3 + $0x240] ss:$16 sps:$4 sm:$0xff]   ;;  %v4725_v2 = vld [vmem:[%s6656_s5 + $0x134] ss:$8 sps:$4 sm:$0xff]  }
 0x1a0   :  { %v1721_v16 = vmul.f32 %v4190_v6, %v5864_v30  ;;  %v4192_v18 = vadd.f32 %v1487_v13, %v5858_v28  ;;  %v4204_v19 = vadd.f32 %v1676_v14, %v5866_v31  ;;  %v1489_v20 = vpop.f32.mrb[7].mxu0  ;;  %v1678_v21 = vpop.f32.mrb[7].mxu1  ;;  %2234 = vmatprep.subr.bf16.mxu0 %v4713_v63  ;;  %3140 = vmatprep.subr.bf16.mxu1 %v4716_v5  ;;  %v4728_v7 = vld [vmem:[%s6657_s3 + $0x264] ss:$16 sps:$4 sm:$0xff]   ;;  %v4723_v14 = vld [vmem:[%s6656_s5 + $0x130] ss:$8 sps:$4 sm:$0xff]  }
 0x1a1   :  { %v1722_v26 = vmul.f32 %v4191_v12, %v5869_v34  ;;  %v4193_v27 = vadd.f32 %v1489_v20, %v5861_v29  ;;  %v4205_v32 = vadd.f32 %v1678_v21, %v5871_v35  ;;  %v1739_v33 = vadd.f32 %v1738_v10, %v1716_v9 }
 0x1a2   :  { %v1725_v38 = vmul.f32 %v4192_v18, %v5864_v30  ;;  %v5937_v40 = vpack.c.bf16 %v4192_v18, %v4190_v6  ;;  %v5939_v41 = vpack.c.bf16 %v4204_v19, %v4202_v11  ;;  %v1723_v46 = vmul.f32 %v4202_v11, %v5874_v39 }
 0x1a3   :  { %v1726_v43 = vmul.f32 %v4193_v27, %v5869_v34  ;;  %v5945_v44 = vpack.c.bf16 %v4193_v27, %v4191_v12  ;;  %v5947_v45 = vpack.c.bf16 %v4205_v32, %v4203_v17  ;;  %1740 = vadd.xlane.f32.xlu0 %v1739_v33  ;;  %2235 = vmatpush1.bf16.msra.mxu0 %v4711_v23 }
 0x1a4   :  { %3141 = vmatpush1.bf16.msra.mxu1 %v4714_v25  ;;  %v1744_v48 = vadd.f32 %v1743_v15, %v1720_v37  ;;  %v1747_v49 = vadd.f32 %v1722_v26, %v1721_v16  ;;  %v1727_v50 = vmul.f32 %v4204_v19, %v5874_v39  ;;  %v1728_v52 = vmul.f32 %v4205_v32, %v5890_v56  ;;  %v4734_v32 = vld [vmem:[%s6657_s3 + $0x284] ss:$16 sps:$4 sm:$0xff]  }
 0x1a5   :  { %v1752_v51 = vadd.f32 %v1726_v43, %v1725_v38  ;;  %v1493_v53 = vpop.f32.mrb[8].mxu0  ;;  %v1682_v57 = vpop.f32.mrb[8].mxu1  ;;  %2211 = vmatprep.mubr.bf16.mxu0 %v5945_v44  ;;  %2236 = vmatprep.subr.bf16.mxu0 %v4719_v36  ;;  %v1724_v13 = vmul.f32 %v4203_v17, %v5890_v56  ;;  %v4731_v17 = vld [vmem:[%s6656_s5 + $0x144] ss:$8 sps:$4 sm:$0xff]   ;;  %v4737_v43 = vld [vmem:[%s6656_s5 + $0x154] ss:$8 sps:$4 sm:$0xff]  }
 0x1a6   :  { %v4194_v61 = vadd.f32 %v1493_v53, %v5858_v28  ;;  %v4206_v62 = vadd.f32 %v1682_v57, %v5866_v31  ;;  %3117 = vmatprep.mubr.bf16.mxu1 %v5945_v44  ;;  %3142 = vmatprep.subr.bf16.mxu1 %v4722_v42  ;;  %v1495_v63 = vpop.f32.mrb[9].mxu0  ;;  %v1684_v0 = vpop.f32.mrb[9].mxu1  ;;  %v1748_v1 = vadd.f32 %v1747_v49, %v1723_v46  ;;  %v4740_v46 = vld [vmem:[%s6657_s3 + $0x2a4] ss:$16 sps:$4 sm:$0xff]   ;;  %v4735_v49 = vld [vmem:[%s6656_s5 + $0x150] ss:$8 sps:$4 sm:$0xff]  }
 0x1a7   :  { %1745 = vadd.xlane.f32.xlu0 %v1744_v48  ;;  %v4195_v3 = vadd.f32 %v1495_v63, %v5861_v29  ;;  %v4207_v4 = vadd.f32 %v1684_v0, %v5871_v35  ;;  %2212 = vmatmul.mubr.bf16.gmra.mrb[16].mxu0 %v5937_v40  ;;  %v1497_v5 = vpop.f32.mrb[10].mxu0  ;;  %v1686_v6 = vpop.f32.mrb[10].mxu1  ;;  %v1753_v8 = vadd.f32 %v1752_v51, %v1727_v50  ;;  %v4743_v50 = vld [vmem:[%s6656_s5 + $0x164] ss:$8 sps:$4 sm:$0xff]   ;;  %v4738_v51 = vld [vmem:[%s6657_s3 + $0x2a0] ss:$16 sps:$4 sm:$0xff]  }
 0x1a8   :  { %v1729_v9 = vmul.f32 %v4194_v61, %v5864_v30  ;;  %2237 = vmatpush1.bf16.msra.mxu0 %v4717_v47  ;;  %3118 = vmatmul.mubr.bf16.gmra.mrb[16].mxu1 %v5937_v40  ;;  %v4196_v10 = vadd.f32 %v1497_v5, %v5858_v28  ;;  %v1499_v11 = vpop.f32.mrb[11].mxu0  ;;  %v1688_v12 = vpop.f32.mrb[11].mxu1  ;;  %v1731_v15 = vmul.f32 %v4206_v62, %v5874_v39  ;;  %v4726_v28 = vld [vmem:[%s6657_s3 + $0x260] ss:$16 sps:$4 sm:$0xff]   ;;  %v4749_v57 = vld [vmem:[%s6656_s5 + $0x174] ss:$8 sps:$4 sm:$0xff]  }
 0x1a9   :  { %v1730_v16 = vmul.f32 %v4195_v3, %v5869_v34  ;;  %3143 = vmatpush1.bf16.msra.mxu1 %v4720_v60  ;;  %v4208_v18 = vadd.f32 %v1686_v6, %v5866_v31  ;;  %v4197_v19 = vadd.f32 %v1499_v11, %v5861_v29  ;;  %v4209_v23 = vadd.f32 %v1688_v12, %v5871_v35  ;;  %v4729_v35 = vld [vmem:[%s6656_s5 + $0x140] ss:$8 sps:$4 sm:$0xff]   ;;  %v4755_v63 = vld [vmem:[%s6656_s5 + $0x184] ss:$8 sps:$4 sm:$0xff]   ;;  %v4759_v6 = vld [vmem:[%s6656_s5 + $0x190] ss:$8 sps:$4 sm:$0xff]  }
 0x1aa   :  { %v1733_v20 = vmul.f32 %v4196_v10, %v5864_v30  ;;  %v5989_v21 = vpack.c.bf16 %v4196_v10, %v4194_v61  ;;  %v1749_v25 = vadd.f32 %v1748_v1, %v1724_v13  ;;  %2238 = vmatprep.subr.bf16.mxu0 %v4725_v2  ;;  %v1732_v31 = vmul.f32 %v4207_v4, %v5890_v56  ;;  %v4741_v53 = vld [vmem:[%s6656_s5 + $0x160] ss:$8 sps:$4 sm:$0xff]   ;;  %v4752_v61 = vld [vmem:[%s6657_s3 + $0x2e4] ss:$16 sps:$4 sm:$0xff]  }
 0x1ab   :  { %v1757_v26 = vadd.f32 %v1730_v16, %v1729_v9  ;;  %v5993_v29 = vpack.c.bf16 %v4208_v18, %v4206_v62  ;;  %v1734_v27 = vmul.f32 %v4197_v19, %v5869_v34  ;;  %3144 = vmatprep.subr.bf16.mxu1 %v4728_v7  ;;  %v1735_v30 = vmul.f32 %v4208_v18, %v5874_v39  ;;  %v4732_v39 = vld [vmem:[%s6657_s3 + $0x280] ss:$16 sps:$4 sm:$0xff]   ;;  %v4758_v1 = vld [vmem:[%s6657_s3 + $0x304] ss:$16 sps:$4 sm:$0xff]  }
 0x1ac   :  { %v6000_v33 = vpack.c.bf16 %v4197_v19, %v4195_v3  ;;  %v6002_v36 = vpack.c.bf16 %v4209_v23, %v4207_v4  ;;  %1750 = vadd.xlane.f32.xlu1 %v1749_v25  ;;  %2239 = vmatpush1.bf16.msra.mxu0 %v4723_v14  ;;  %v1754_v34 = vadd.f32 %v1753_v8, %v1728_v52  ;;  %v4746_v52 = vld [vmem:[%s6657_s3 + $0x2c4] ss:$16 sps:$4 sm:$0xff]   ;;  %v4744_v60 = vld [vmem:[%s6657_s3 + $0x2c0] ss:$16 sps:$4 sm:$0xff]  }
 0x1ad   :  { %v1762_v37 = vadd.f32 %v1734_v27, %v1733_v20  ;;  %3145 = vmatpush1.bf16.msra.mxu1 %v4726_v28  ;;  %2240 = vmatprep.subr.bf16.mxu0 %v4731_v17  ;;  %v1758_v38 = vadd.f32 %v1757_v26, %v1731_v15  ;;  %v1736_v42 = vmul.f32 %v4209_v23, %v5890_v56  ;;  %v4747_v62 = vld [vmem:[%s6656_s5 + $0x170] ss:$8 sps:$4 sm:$0xff]   ;;  %v4753_v2 = vld [vmem:[%s6656_s5 + $0x180] ss:$8 sps:$4 sm:$0xff]   ;;  %v4761_v3 = vld [vmem:[%s6656_s5 + $0x194] ss:$8 sps:$4 sm:$0xff]  }
 0x1ae   :  { %2221 = vmatprep.mubr.bf16.mxu0 %v6000_v33  ;;  %3127 = vmatprep.mubr.bf16.mxu1 %v6000_v33  ;;  %v4750_v0 = vld [vmem:[%s6657_s3 + $0x2e0] ss:$16 sps:$4 sm:$0xff]   ;;  %v4764_v5 = vld [vmem:[%s6657_s3 + $0x324] ss:$16 sps:$4 sm:$0xff]  }
 0x1af   :  { %3146 = vmatprep.subr.bf16.mxu1 %v4734_v32  ;;  %2222 = vmatmul.mubr.bf16.gmra.mrb[20].mxu0 %v5989_v21  ;;  %v1759_v47 = vadd.f32 %v1758_v38, %v1732_v31  ;;  %v1763_v48 = vadd.f32 %v1762_v37, %v1735_v30  ;;  %v4756_v4 = vld [vmem:[%s6657_s3 + $0x300] ss:$16 sps:$4 sm:$0xff]   ;;  %v4767_v7 = vld [vmem:[%s6656_s5 + $0x1a4] ss:$8 sps:$4 sm:$0xff]   ;;  %v4773_v11 = vld [vmem:[%s6656_s5 + $0x1b4] ss:$8 sps:$4 sm:$0xff]  }
 0x1b0   :  { %1755 = vadd.xlane.f32.xlu1 %v1754_v34  ;;  %2241 = vmatpush1.bf16.msra.mxu0 %v4729_v35  ;;  %v4762_v8 = vld [vmem:[%s6657_s3 + $0x320] ss:$16 sps:$4 sm:$0xff]   ;;  %v4770_v9 = vld [vmem:[%s6657_s3 + $0x344] ss:$16 sps:$4 sm:$0xff]   ;;  %v4803_v34 = vld [vmem:[%s6657_s3 + $0xc] ss:$16 sps:$4 sm:$0xff]  }
 0x1b1   :  { %3128 = vmatmul.mubr.bf16.gmra.mrb[20].mxu1 %v5989_v21  ;;  %2264 = vmatprep.mubr.bf16.mxu0 %v5895_v59  ;;  %v1764_v56 = vadd.f32 %v1763_v48, %v1736_v42  ;;  %v4765_v10 = vld [vmem:[%s6656_s5 + $0x1a0] ss:$8 sps:$4 sm:$0xff]   ;;  %v4776_v13 = vld [vmem:[%s6657_s3 + $0x364] ss:$16 sps:$4 sm:$0xff]   ;;  %v4771_v14 = vld [vmem:[%s6656_s5 + $0x1b0] ss:$8 sps:$4 sm:$0xff]  }
 0x1b2   :  { %3147 = vmatpush1.bf16.msra.mxu1 %v4732_v39  ;;  %3170 = vmatprep.mubr.bf16.mxu1 %v5895_v59  ;;  %v4768_v12 = vld [vmem:[%s6657_s3 + $0x340] ss:$16 sps:$4 sm:$0xff]   ;;  %v4779_v15 = vld [vmem:[%s6656_s5 + $0x1c4] ss:$8 sps:$4 sm:$0xff]   ;;  %v4785_v28 = vld [vmem:[%s6656_s5 + $0x1d4] ss:$8 sps:$4 sm:$0xff]  }
 0x1b3   :  { %2242 = vmatprep.subr.bf16.mxu0 %v4737_v43  ;;  %3148 = vmatprep.subr.bf16.mxu1 %v4740_v46  ;;  %v4774_v16 = vld [vmem:[%s6657_s3 + $0x360] ss:$16 sps:$4 sm:$0xff]   ;;  %v4782_v18 = vld [vmem:[%s6657_s3 + $0x384] ss:$16 sps:$4 sm:$0xff]   ;;  %v4801_v39 = vld [vmem:[%s6657_s3 + $0x8] ss:$16 sps:$4 sm:$0xff]  }
 0x1b4   :  { %1760 = vadd.xlane.f32.xlu0 %v1759_v47  ;;  %2243 = vmatpush1.bf16.msra.mxu0 %v4735_v49  ;;  %v4777_v19 = vld [vmem:[%s6656_s5 + $0x1c0] ss:$8 sps:$4 sm:$0xff]   ;;  %v4788_v20 = vld [vmem:[%s6657_s3 + $0x3a4] ss:$16 sps:$4 sm:$0xff]   ;;  %v4783_v23 = vld [vmem:[%s6656_s5 + $0x1d0] ss:$8 sps:$4 sm:$0xff]  }
 0x1b5   :  { %1765 = vadd.xlane.f32.xlu1 %v1764_v56  ;;  %2244 = vmatprep.subr.bf16.mxu0 %v4743_v50  ;;  %v4780_v17 = vld [vmem:[%s6657_s3 + $0x380] ss:$16 sps:$4 sm:$0xff]   ;;  %v4791_v25 = vld [vmem:[%s6656_s5 + $0x1e4] ss:$8 sps:$4 sm:$0xff]   ;;  %v4797_v32 = vld [vmem:[%s6656_s5 + $0x1f4] ss:$8 sps:$4 sm:$0xff]  }
 0x1b6   :  { %3149 = vmatpush1.bf16.msra.mxu1 %v4738_v51  ;;  %v4786_v26 = vld [vmem:[%s6657_s3 + $0x3a0] ss:$16 sps:$4 sm:$0xff]   ;;  %v4794_v31 = vld [vmem:[%s6657_s3 + $0x3c4] ss:$16 sps:$4 sm:$0xff]   ;;  %v4806_v42 = vld [vmem:[%s6657_s3 + $0x2c] ss:$16 sps:$4 sm:$0xff]  }
 0x1b7   :  { %3150 = vmatprep.subr.bf16.mxu1 %v4746_v52  ;;  %v4789_v27 = vld [vmem:[%s6656_s5 + $0x1e0] ss:$8 sps:$4 sm:$0xff]   ;;  %v4800_v35 = vld [vmem:[%s6657_s3 + $0x3e4] ss:$16 sps:$4 sm:$0xff]   ;;  %v4795_v37 = vld [vmem:[%s6656_s5 + $0x1f0] ss:$8 sps:$4 sm:$0xff]  }
 0x1b8   :  { %2245 = vmatpush1.bf16.msra.mxu0 %v4741_v53  ;;  %v4792_v30 = vld [vmem:[%s6657_s3 + $0x3c0] ss:$16 sps:$4 sm:$0xff]   ;;  %v4804_v43 = vld [vmem:[%s6657_s3 + $0x28] ss:$16 sps:$4 sm:$0xff]   ;;  %v4809_v46 = vld [vmem:[%s6657_s3 + $0x4c] ss:$16 sps:$4 sm:$0xff]  }
 0x1b9   :  { %2246 = vmatprep.subr.bf16.mxu0 %v4749_v57  ;;  %v4798_v38 = vld [vmem:[%s6657_s3 + $0x3e0] ss:$16 sps:$4 sm:$0xff]   ;;  %v4807_v47 = vld [vmem:[%s6657_s3 + $0x48] ss:$16 sps:$4 sm:$0xff]   ;;  %v4812_v48 = vld [vmem:[%s6657_s3 + $0x6c] ss:$16 sps:$4 sm:$0xff]  }
 0x1ba   :  { %3151 = vmatpush1.bf16.msra.mxu1 %v4744_v60  ;;  %v4810_v49 = vld [vmem:[%s6657_s3 + $0x68] ss:$16 sps:$4 sm:$0xff]   ;;  %v4815_v56 = vld [vmem:[%s6657_s3 + $0x8c] ss:$16 sps:$4 sm:$0xff]  }
 0x1bb   :  { %3152 = vmatprep.subr.bf16.mxu1 %v4752_v61  ;;  %v4813_v50 = vld [vmem:[%s6657_s3 + $0x88] ss:$16 sps:$4 sm:$0xff]   ;;  %v4818_v51 = vld [vmem:[%s6657_s3 + $0xac] ss:$16 sps:$4 sm:$0xff]  }
 0x1bc   :  { %2247 = vmatpush1.bf16.msra.mxu0 %v4747_v62  ;;  %v4816_v52 = vld [vmem:[%s6657_s3 + $0xa8] ss:$16 sps:$4 sm:$0xff]   ;;  %v4821_v53 = vld [vmem:[%s6657_s3 + $0xcc] ss:$16 sps:$4 sm:$0xff]  }
 0x1bd   :  { %2248 = vmatprep.subr.bf16.mxu0 %v4755_v63  ;;  %v4819_v57 = vld [vmem:[%s6657_s3 + $0xc8] ss:$16 sps:$4 sm:$0xff]   ;;  %v4827_v61 = vld [vmem:[%s6657_s3 + $0x10c] ss:$16 sps:$4 sm:$0xff]  }
 0x1be   :  { %3153 = vmatpush1.bf16.msra.mxu1 %v4750_v0  ;;  %v4822_v60 = vld [vmem:[%s6657_s3 + $0xe8] ss:$16 sps:$4 sm:$0xff]   ;;  %v4830_v63 = vld [vmem:[%s6657_s3 + $0x12c] ss:$16 sps:$4 sm:$0xff]  }
 0x1bf   :  { %3154 = vmatprep.subr.bf16.mxu1 %v4758_v1  ;;  %v4825_v62 = vld [vmem:[%s6657_s3 + $0x108] ss:$16 sps:$4 sm:$0xff]   ;;  %v4833_v1 = vld [vmem:[%s6657_s3 + $0x14c] ss:$16 sps:$4 sm:$0xff]  }
 0x1c0   :  { %2249 = vmatpush1.bf16.msra.mxu0 %v4753_v2  ;;  %v4828_v0 = vld [vmem:[%s6657_s3 + $0x128] ss:$16 sps:$4 sm:$0xff]  }
 0x1c1   :  { %2250 = vmatprep.subr.bf16.mxu0 %v4761_v3  ;;  %v4831_v2 = vld [vmem:[%s6657_s3 + $0x148] ss:$16 sps:$4 sm:$0xff]   ;;  %v4836_v3 = vld [vmem:[%s6657_s3 + $0x16c] ss:$16 sps:$4 sm:$0xff]  }
 0x1c2   :  { %3155 = vmatpush1.bf16.msra.mxu1 %v4756_v4  ;;  %v4834_v4 = vld [vmem:[%s6657_s3 + $0x168] ss:$16 sps:$4 sm:$0xff]  }
 0x1c3   :  { %3156 = vmatprep.subr.bf16.mxu1 %v4764_v5  ;;  %v4839_v5 = vld [vmem:[%s6657_s3 + $0x18c] ss:$16 sps:$4 sm:$0xff]  }
 0x1c4   :  { %2251 = vmatpush1.bf16.msra.mxu0 %v4759_v6  ;;  %v4837_v6 = vld [vmem:[%s6657_s3 + $0x188] ss:$16 sps:$4 sm:$0xff]  }
 0x1c5   :  { %2252 = vmatprep.subr.bf16.mxu0 %v4767_v7  ;;  %v4842_v7 = vld [vmem:[%s6657_s3 + $0x1ac] ss:$16 sps:$4 sm:$0xff]  }
 0x1c6   :  { %3157 = vmatpush1.bf16.msra.mxu1 %v4762_v8  ;;  %v4840_v8 = vld [vmem:[%s6657_s3 + $0x1a8] ss:$16 sps:$4 sm:$0xff]  }
 0x1c7   :  { %3158 = vmatprep.subr.bf16.mxu1 %v4770_v9  ;;  %v4845_v9 = vld [vmem:[%s6657_s3 + $0x1cc] ss:$16 sps:$4 sm:$0xff]  }
 0x1c8   :  { %2253 = vmatpush1.bf16.msra.mxu0 %v4765_v10  ;;  %v4843_v10 = vld [vmem:[%s6657_s3 + $0x1c8] ss:$16 sps:$4 sm:$0xff]  }
 0x1c9   :  { %2254 = vmatprep.subr.bf16.mxu0 %v4773_v11  ;;  %v4848_v11 = vld [vmem:[%s6657_s3 + $0x1ec] ss:$16 sps:$4 sm:$0xff]  }
 0x1ca   :  { %3159 = vmatpush1.bf16.msra.mxu1 %v4768_v12  ;;  %v4846_v12 = vld [vmem:[%s6657_s3 + $0x1e8] ss:$16 sps:$4 sm:$0xff]  }
 0x1cb   :  { %3160 = vmatprep.subr.bf16.mxu1 %v4776_v13  ;;  %v4851_v13 = vld [vmem:[%s6657_s3 + $0x20c] ss:$16 sps:$4 sm:$0xff]  }
 0x1cc   :  { %2255 = vmatpush1.bf16.msra.mxu0 %v4771_v14  ;;  %v4849_v14 = vld [vmem:[%s6657_s3 + $0x208] ss:$16 sps:$4 sm:$0xff]  }
 0x1cd   :  { %2256 = vmatprep.subr.bf16.mxu0 %v4779_v15  ;;  %v4854_v15 = vld [vmem:[%s6657_s3 + $0x22c] ss:$16 sps:$4 sm:$0xff]  }
 0x1ce   :  { %3161 = vmatpush1.bf16.msra.mxu1 %v4774_v16  ;;  %v4852_v16 = vld [vmem:[%s6657_s3 + $0x228] ss:$16 sps:$4 sm:$0xff]  }
 0x1cf   :  { %3162 = vmatprep.subr.bf16.mxu1 %v4782_v18  ;;  %v4857_v18 = vld [vmem:[%s6657_s3 + $0x24c] ss:$16 sps:$4 sm:$0xff]  }
 0x1d0   :  { %2257 = vmatpush1.bf16.msra.mxu0 %v4777_v19  ;;  %v4855_v19 = vld [vmem:[%s6657_s3 + $0x248] ss:$16 sps:$4 sm:$0xff]  }
 0x1d1   :  { %2258 = vmatprep.subr.bf16.mxu0 %v4785_v28  ;;  %v4863_v28 = vld [vmem:[%s6657_s3 + $0x28c] ss:$16 sps:$4 sm:$0xff]  }
 0x1d2   :  { %3163 = vmatpush1.bf16.msra.mxu1 %v4780_v17  ;;  %v4861_v17 = vld [vmem:[%s6657_s3 + $0x288] ss:$16 sps:$4 sm:$0xff]  }
 0x1d3   :  { %3164 = vmatprep.subr.bf16.mxu1 %v4788_v20  ;;  %v4869_v20 = vld [vmem:[%s6657_s3 + $0x2cc] ss:$16 sps:$4 sm:$0xff]  }
 0x1d4   :  { %2259 = vmatpush1.bf16.msra.mxu0 %v4783_v23  ;;  %v4867_v23 = vld [vmem:[%s6657_s3 + $0x2c8] ss:$16 sps:$4 sm:$0xff]  }
 0x1d5   :  { %2260 = vmatprep.subr.bf16.mxu0 %v4791_v25  ;;  %v4875_v25 = vld [vmem:[%s6657_s3 + $0x30c] ss:$16 sps:$4 sm:$0xff]  }
 0x1d6   :  { %3165 = vmatpush1.bf16.msra.mxu1 %v4786_v26  ;;  %v4873_v26 = vld [vmem:[%s6657_s3 + $0x308] ss:$16 sps:$4 sm:$0xff]  }
 0x1d7   :  { %3166 = vmatprep.subr.bf16.mxu1 %v4794_v31  ;;  %v4878_v31 = vld [vmem:[%s6657_s3 + $0x32c] ss:$16 sps:$4 sm:$0xff]  }
 0x1d8   :  { %2261 = vmatpush1.bf16.msra.mxu0 %v4789_v27  ;;  %v4876_v27 = vld [vmem:[%s6657_s3 + $0x328] ss:$16 sps:$4 sm:$0xff]  }
 0x1d9   :  { %2262 = vmatprep.subr.bf16.mxu0 %v4797_v32  ;;  %v4881_v32 = vld [vmem:[%s6657_s3 + $0x34c] ss:$16 sps:$4 sm:$0xff]  }
 0x1da   :  { %3167 = vmatpush1.bf16.msra.mxu1 %v4792_v30  ;;  %v4879_v30 = vld [vmem:[%s6657_s3 + $0x348] ss:$16 sps:$4 sm:$0xff]  }
 0x1db   :  { %3168 = vmatprep.subr.bf16.mxu1 %v4800_v35  ;;  %v4884_v35 = vld [vmem:[%s6657_s3 + $0x36c] ss:$16 sps:$4 sm:$0xff]  }
 0x1dc   :  { %2263 = vmatpush1.bf16.msra.mxu0 %v4795_v37  ;;  %v4882_v37 = vld [vmem:[%s6657_s3 + $0x368] ss:$16 sps:$4 sm:$0xff]  }
 0x1dd   :  { %3201 = vmatprep.subr.bf16.mxu0 %v4803_v34  ;;  %v4887_v34 = vld [vmem:[%s6657_s3 + $0x38c] ss:$16 sps:$4 sm:$0xff]  }
 0x1de   :  { %3169 = vmatpush1.bf16.msra.mxu1 %v4798_v38  ;;  %v4897_v38 = vld [vmem:[%s6660_s6] ss:$8 sps:$4 sm:$0xff]  }
 0x1df   :  { %2265 = vmatmul.mubr.bf16.vlgmr.msra.gmra.mrb[12].mxu0 %v5888_v55 }
 0x1e0   :  { %2274 = vmatprep.mubr.bf16.mxu0 %v5947_v45  ;;  %3202 = vmatpush1.bf16.msra.mxu0 %v4801_v39  ;;  %v4899_v39 = vld [vmem:[%s6660_s6 + $0x4] ss:$8 sps:$4 sm:$0xff]  }
 0x1e1   :  { %3171 = vmatmul.mubr.bf16.vlgmr.msra.gmra.mrb[12].mxu1 %v5888_v55  ;;  %3203 = vmatprep.subr.bf16.mxu0 %v4806_v42  ;;  %v4902_v42 = vld [vmem:[%s6660_s6 + $0x14] ss:$8 sps:$4 sm:$0xff]  }
 0x1e2   :  { %3180 = vmatprep.mubr.bf16.mxu1 %v5947_v45  ;;  %3669 = vmatprep.subr.bf16.mxu1 %v4899_v39 }
 0x1e3   :  { %3670 = vmatpush1.bf16.msra.mxu1 %v4897_v38  ;;  %v4942_v38 = vld [vmem:[%s6660_s6 + $0xf0] ss:$8 sps:$4 sm:$0xff]  }
 0x1e4   :  { %3204 = vmatpush1.bf16.msra.mxu0 %v4804_v43  ;;  %v4885_v43 = vld [vmem:[%s6657_s3 + $0x388] ss:$16 sps:$4 sm:$0xff]   ;;  %3671 = vmatprep.subr.bf16.mxu1 %v4902_v42 }
 0x1e5   :  { %3205 = vmatprep.subr.bf16.mxu0 %v4809_v46  ;;  %v4890_v46 = vld [vmem:[%s6657_s3 + $0x3ac] ss:$16 sps:$4 sm:$0xff]  }
 0x1e7   :  { %2275 = vmatmul.mubr.bf16.gmra.mrb[16].mxu0 %v5939_v41 }
 0x1e8   :  { %2284 = vmatprep.mubr.bf16.mxu0 %v6002_v36  ;;  %3206 = vmatpush1.bf16.msra.mxu0 %v4807_v47  ;;  %v4900_v47 = vld [vmem:[%s6660_s6 + $0x10] ss:$8 sps:$4 sm:$0xff]  }
 0x1e9   :  { %3181 = vmatmul.mubr.bf16.gmra.mrb[16].mxu1 %v5939_v41  ;;  %3207 = vmatprep.subr.bf16.mxu0 %v4812_v48  ;;  %v4905_v48 = vld [vmem:[%s6660_s6 + $0x24] ss:$8 sps:$4 sm:$0xff]  }
 0x1ea   :  { %3190 = vmatprep.mubr.bf16.mxu1 %v6002_v36  ;;  %3672 = vmatpush1.bf16.msra.mxu1 %v4900_v47 }
 0x1eb   :  { %3673 = vmatprep.subr.bf16.mxu1 %v4905_v48 }
 0x1ec   :  { %3208 = vmatpush1.bf16.msra.mxu0 %v4810_v49  ;;  %v4888_v49 = vld [vmem:[%s6657_s3 + $0x3a8] ss:$16 sps:$4 sm:$0xff]  }
 0x1ed   :  { %3209 = vmatprep.subr.bf16.mxu0 %v4815_v56  ;;  %v4893_v56 = vld [vmem:[%s6657_s3 + $0x3cc] ss:$16 sps:$4 sm:$0xff]  }
 0x1ef   :  { %2285 = vmatmul.mubr.bf16.gmra.mrb[20].mxu0 %v5993_v29 }
 0x1f0   :  { %3210 = vmatpush1.bf16.msra.mxu0 %v4813_v50  ;;  %3233 = vmatprep.mubr.bf16.mxu0 %v5893_v58  ;;  %v4824_v58 = vld [vmem:[%s6657_s3 + $0xec] ss:$16 sps:$4 sm:$0xff]   ;;  %v4903_v50 = vld [vmem:[%s6660_s6 + $0x20] ss:$8 sps:$4 sm:$0xff]  }
 0x1f1   :  { %3191 = vmatmul.mubr.bf16.gmra.mrb[20].mxu1 %v5993_v29  ;;  %3211 = vmatprep.subr.bf16.mxu0 %v4818_v51  ;;  %v4908_v51 = vld [vmem:[%s6660_s6 + $0x34] ss:$8 sps:$4 sm:$0xff]  }
 0x1f2   :  { %3674 = vmatpush1.bf16.msra.mxu1 %v4903_v50 }
 0x1f3   :  { %3675 = vmatprep.subr.bf16.mxu1 %v4908_v51 }
 0x1f4   :  { %3212 = vmatpush1.bf16.msra.mxu0 %v4816_v52  ;;  %v4891_v52 = vld [vmem:[%s6657_s3 + $0x3c8] ss:$16 sps:$4 sm:$0xff]  }
 0x1f5   :  { %3213 = vmatprep.subr.bf16.mxu0 %v4821_v53  ;;  %v4896_v53 = vld [vmem:[%s6657_s3 + $0x3ec] ss:$16 sps:$4 sm:$0xff]  }
 0x1f8   :  { %3214 = vmatpush1.bf16.msra.mxu0 %v4819_v57  ;;  %v4906_v57 = vld [vmem:[%s6660_s6 + $0x30] ss:$8 sps:$4 sm:$0xff]  }
 0x1f9   :  { %3215 = vmatprep.subr.bf16.mxu0 %v4824_v58  ;;  %v4894_v58 = vld [vmem:[%s6657_s3 + $0x3e8] ss:$16 sps:$4 sm:$0xff]   ;;  %3676 = vmatpush1.bf16.msra.mxu1 %v4906_v57 }
 0x1fc   :  { %3216 = vmatpush1.bf16.msra.mxu0 %v4822_v60  ;;  %v4911_v60 = vld [vmem:[%s6660_s6 + $0x44] ss:$8 sps:$4 sm:$0xff]  }
 0x1fd   :  { %3217 = vmatprep.subr.bf16.mxu0 %v4827_v61  ;;  %v4909_v61 = vld [vmem:[%s6660_s6 + $0x40] ss:$8 sps:$4 sm:$0xff]   ;;  %3677 = vmatprep.subr.bf16.mxu1 %v4911_v60 }
 0x1fe   :  { %3678 = vmatpush1.bf16.msra.mxu1 %v4909_v61 }
 0x200   :  { %3218 = vmatpush1.bf16.msra.mxu0 %v4825_v62  ;;  %v4914_v62 = vld [vmem:[%s6660_s6 + $0x54] ss:$8 sps:$4 sm:$0xff]  }
 0x201   :  { %3219 = vmatprep.subr.bf16.mxu0 %v4830_v63  ;;  %v4912_v63 = vld [vmem:[%s6660_s6 + $0x50] ss:$8 sps:$4 sm:$0xff]   ;;  %3679 = vmatprep.subr.bf16.mxu1 %v4914_v62 }
 0x202   :  { %3680 = vmatpush1.bf16.msra.mxu1 %v4912_v63 }
 0x204   :  { %3220 = vmatpush1.bf16.msra.mxu0 %v4828_v0  ;;  %v4917_v0 = vld [vmem:[%s6660_s6 + $0x64] ss:$8 sps:$4 sm:$0xff]  }
 0x205   :  { %3221 = vmatprep.subr.bf16.mxu0 %v4833_v1  ;;  %v4915_v1 = vld [vmem:[%s6660_s6 + $0x60] ss:$8 sps:$4 sm:$0xff]   ;;  %3681 = vmatprep.subr.bf16.mxu1 %v4917_v0 }
 0x206   :  { %3682 = vmatpush1.bf16.msra.mxu1 %v4915_v1 }
 0x208   :  { %3222 = vmatpush1.bf16.msra.mxu0 %v4831_v2  ;;  %v4920_v2 = vld [vmem:[%s6660_s6 + $0x74] ss:$8 sps:$4 sm:$0xff]  }
 0x209   :  { %3223 = vmatprep.subr.bf16.mxu0 %v4836_v3  ;;  %v4918_v3 = vld [vmem:[%s6660_s6 + $0x70] ss:$8 sps:$4 sm:$0xff]   ;;  %3683 = vmatprep.subr.bf16.mxu1 %v4920_v2 }
 0x20a   :  { %3684 = vmatpush1.bf16.msra.mxu1 %v4918_v3 }
 0x20c   :  { %3224 = vmatpush1.bf16.msra.mxu0 %v4834_v4  ;;  %v4926_v4 = vld [vmem:[%s6660_s6 + $0x94] ss:$8 sps:$4 sm:$0xff]  }
 0x20d   :  { %3225 = vmatprep.subr.bf16.mxu0 %v4839_v5  ;;  %v4924_v5 = vld [vmem:[%s6660_s6 + $0x90] ss:$8 sps:$4 sm:$0xff]  }
 0x210   :  { %3226 = vmatpush1.bf16.msra.mxu0 %v4837_v6 }
 0x211   :  { %3227 = vmatprep.subr.bf16.mxu0 %v4842_v7 }
 0x214   :  { %3228 = vmatpush1.bf16.msra.mxu0 %v4840_v8  ;;  %v4929_v8 = vld [vmem:[%s6660_s6 + $0xa4] ss:$8 sps:$4 sm:$0xff]  }
 0x215   :  { %3229 = vmatprep.subr.bf16.mxu0 %v4845_v9 }
 0x218   :  { %3230 = vmatpush1.bf16.msra.mxu0 %v4843_v10  ;;  %v4927_v10 = vld [vmem:[%s6660_s6 + $0xa0] ss:$8 sps:$4 sm:$0xff]  }
 0x219   :  { %3231 = vmatprep.subr.bf16.mxu0 %v4848_v11 }
 0x21c   :  { %3232 = vmatpush1.bf16.msra.mxu0 %v4846_v12 }
 0x21d   :  { %3264 = vmatprep.subr.bf16.mxu0 %v4851_v13  ;;  %v4932_v13 = vld [vmem:[%s6660_s6 + $0xb4] ss:$8 sps:$4 sm:$0xff]  }
 0x21f   :  { %3234 = vmatmul.mubr.bf16.vlgmr.msra.gmra.mrb[24].mxu0 %v5886_v54  ;;  %v4860_v54 = vld [vmem:[%s6657_s3 + $0x26c] ss:$16 sps:$4 sm:$0xff]  }
 0x220   :  { %3243 = vmatprep.mubr.bf16.mxu0 %v5945_v44  ;;  %3265 = vmatpush1.bf16.msra.mxu0 %v4849_v14  ;;  %v4858_v44 = vld [vmem:[%s6657_s3 + $0x268] ss:$16 sps:$4 sm:$0xff]  }
 0x221   :  { %3266 = vmatprep.subr.bf16.mxu0 %v4854_v15  ;;  %v4930_v14 = vld [vmem:[%s6660_s6 + $0xb0] ss:$8 sps:$4 sm:$0xff]  }
 0x224   :  { %3267 = vmatpush1.bf16.msra.mxu0 %v4852_v16 }
 0x225   :  { %3268 = vmatprep.subr.bf16.mxu0 %v4857_v18 }
 0x227   :  { %3244 = vmatmul.mubr.bf16.gmra.mrb[28].mxu0 %v5937_v40  ;;  %v4866_v40 = vld [vmem:[%s6657_s3 + $0x2ac] ss:$16 sps:$4 sm:$0xff]  }
 0x228   :  { %3253 = vmatprep.mubr.bf16.mxu0 %v6000_v33  ;;  %3269 = vmatpush1.bf16.msra.mxu0 %v4855_v19  ;;  %v4864_v33 = vld [vmem:[%s6657_s3 + $0x2a8] ss:$16 sps:$4 sm:$0xff]  }
 0x229   :  { %3270 = vmatprep.subr.bf16.mxu0 %v4860_v54  ;;  %v4935_v54 = vld [vmem:[%s6660_s6 + $0xc4] ss:$8 sps:$4 sm:$0xff]  }
 0x22c   :  { %3271 = vmatpush1.bf16.msra.mxu0 %v4858_v44 }
 0x22d   :  { %3272 = vmatprep.subr.bf16.mxu0 %v4863_v28 }
 0x22f   :  { %3254 = vmatmul.mubr.bf16.gmra.mrb[32].mxu0 %v5989_v21  ;;  %v4872_v21 = vld [vmem:[%s6657_s3 + $0x2ec] ss:$16 sps:$4 sm:$0xff]  }
 0x230   :  { %3273 = vmatpush1.bf16.msra.mxu0 %v4861_v17  ;;  %3296 = vmatprep.mubr.bf16.mxu0 %v5895_v59  ;;  %v4870_v59 = vld [vmem:[%s6657_s3 + $0x2e8] ss:$16 sps:$4 sm:$0xff]  }
 0x231   :  { %3274 = vmatprep.subr.bf16.mxu0 %v4866_v40  ;;  %v4933_v17 = vld [vmem:[%s6660_s6 + $0xc0] ss:$8 sps:$4 sm:$0xff]  }
 0x234   :  { %3275 = vmatpush1.bf16.msra.mxu0 %v4864_v33 }
 0x235   :  { %3276 = vmatprep.subr.bf16.mxu0 %v4869_v20  ;;  %v4938_v20 = vld [vmem:[%s6660_s6 + $0xd4] ss:$8 sps:$4 sm:$0xff]  }
 0x238   :  { %3277 = vmatpush1.bf16.msra.mxu0 %v4867_v23  ;;  %v4936_v23 = vld [vmem:[%s6660_s6 + $0xd0] ss:$8 sps:$4 sm:$0xff]  }
 0x239   :  { %3278 = vmatprep.subr.bf16.mxu0 %v4872_v21 }
 0x23c   :  { %3279 = vmatpush1.bf16.msra.mxu0 %v4870_v59 }
 0x23d   :  { %3280 = vmatprep.subr.bf16.mxu0 %v4875_v25 }
 0x240   :  { %3281 = vmatpush1.bf16.msra.mxu0 %v4873_v26 }
 0x241   :  { %3282 = vmatprep.subr.bf16.mxu0 %v4878_v31  ;;  %v4941_v31 = vld [vmem:[%s6660_s6 + $0xe4] ss:$8 sps:$4 sm:$0xff]  }
 0x244   :  { %3283 = vmatpush1.bf16.msra.mxu0 %v4876_v27 }
 0x245   :  { %3284 = vmatprep.subr.bf16.mxu0 %v4881_v32 }
 0x248   :  { %3285 = vmatpush1.bf16.msra.mxu0 %v4879_v30  ;;  %v4939_v30 = vld [vmem:[%s6660_s6 + $0xe0] ss:$8 sps:$4 sm:$0xff]  }
 0x249   :  { %3286 = vmatprep.subr.bf16.mxu0 %v4884_v35 }
 0x24c   :  { %3287 = vmatpush1.bf16.msra.mxu0 %v4882_v37 }
 0x24d   :  { %3288 = vmatprep.subr.bf16.mxu0 %v4887_v34  ;;  %v4944_v34 = vld [vmem:[%s6660_s6 + $0xf4] ss:$8 sps:$4 sm:$0xff]  }
 0x250   :  { %3289 = vmatpush1.bf16.msra.mxu0 %v4885_v43 }
 0x251   :  { %3290 = vmatprep.subr.bf16.mxu0 %v4890_v46 }
 0x254   :  { %3291 = vmatpush1.bf16.msra.mxu0 %v4888_v49 }
 0x255   :  { %3292 = vmatprep.subr.bf16.mxu0 %v4893_v56 }
 0x258   :  { %3293 = vmatpush1.bf16.msra.mxu0 %v4891_v52 }
 0x259   :  { %3294 = vmatprep.subr.bf16.mxu0 %v4896_v53 }
 0x25c   :  { %3295 = vmatpush1.bf16.msra.mxu0 %v4894_v58 }
 0x25f   :  { %3297 = vmatmul.mubr.bf16.vlgmr.msra.gmra.mrb[24].mxu0 %v5888_v55  ;;  %v4923_v55 = vld [vmem:[%s6660_s6 + $0x84] ss:$8 sps:$4 sm:$0xff]  }
 0x260   :  { %3306 = vmatprep.mubr.bf16.mxu0 %v5947_v45  ;;  %v4921_v45 = vld [vmem:[%s6660_s6 + $0x80] ss:$8 sps:$4 sm:$0xff]   ;;  %3685 = vmatprep.subr.bf16.mxu1 %v4923_v55 }
 0x261   :  { %3686 = vmatpush1.bf16.msra.mxu1 %v4921_v45 }
 0x262   :  { %3687 = vmatprep.subr.bf16.mxu1 %v4926_v4 }
 0x265   :  { %3688 = vmatpush1.bf16.msra.mxu1 %v4924_v5 }
 0x266   :  { %3689 = vmatprep.subr.bf16.mxu1 %v4929_v8 }
 0x267   :  { %3307 = vmatmul.mubr.bf16.gmra.mrb[28].mxu0 %v5939_v41 }
 0x268   :  { %3316 = vmatprep.mubr.bf16.mxu0 %v6002_v36 }
 0x269   :  { %3690 = vmatpush1.bf16.msra.mxu1 %v4927_v10 }
 0x26a   :  { %3691 = vmatprep.subr.bf16.mxu1 %v4932_v13 }
 0x26d   :  { %3692 = vmatpush1.bf16.msra.mxu1 %v4930_v14 }
 0x26e   :  { %3693 = vmatprep.subr.bf16.mxu1 %v4935_v54 }
 0x26f   :  { %3317 = vmatmul.mubr.bf16.gmra.mrb[32].mxu0 %v5993_v29 }
 0x271   :  { %3694 = vmatpush1.bf16.msra.mxu1 %v4933_v17 }
 0x272   :  { %3695 = vmatprep.subr.bf16.mxu1 %v4938_v20 }
 0x275   :  { %3696 = vmatpush1.bf16.msra.mxu1 %v4936_v23 }
 0x276   :  { %3697 = vmatprep.subr.bf16.mxu1 %v4941_v31 }
 0x279   :  { %3698 = vmatpush1.bf16.msra.mxu1 %v4939_v30 }
 0x27a   :  { %3699 = vmatprep.subr.bf16.mxu1 %v4944_v34 }
 0x27d   :  { %3700 = vmatpush1.bf16.msra.mxu1 %v4942_v38 }
 0x2b2   :  { %v2266_v41 = vpop.f32.mrb[12].mxu0 }
 0x2b3   :  { %2295 = vst [vmem:[%s6661_s8] sm:$0xff] %v2266_v41  ;;  %v2268_v36 = vpop.f32.mrb[13].mxu0 }
 0x2b4   :  { %v3172_v6 = vpop.f32.mrb[12].mxu1  ;;  %2296 = vst [vmem:[%s6661_s8 + $0x8] sm:$0xff] %v2268_v36  ;;  %v2270_v7 = vpop.f32.mrb[14].mxu0 }
 0x2b5   :  { %v3174_v9 = vpop.f32.mrb[13].mxu1  ;;  %2297 = vst [vmem:[%s6661_s8 + $0x10] sm:$0xff] %v2270_v7  ;;  %v2272_v29 = vpop.f32.mrb[15].mxu0  ;;  %v3327_v42 = vmul.f32 %v3172_v6, %v3172_v6 }
 0x2b6   :  { %v3176_v11 = vpop.f32.mrb[14].mxu1  ;;  %2298 = vst [vmem:[%s6661_s8 + $0x18] sm:$0xff] %v2272_v29  ;;  %v3328_v47 = vmul.f32 %v3174_v9, %v3174_v9 }
 0x2b7   :  { %v3178_v12 = vpop.f32.mrb[15].mxu1  ;;  %v3329_v56 = vmul.f32 %v3176_v11, %v3176_v11 }
 0x2b8   :  { %v3330_v53 = vmul.f32 %v3178_v12, %v3178_v12 }
 0x2ba   :  { %v2276_v15 = vpop.f32.mrb[16].mxu0 }
 0x2bb   :  { %2299 = vst [vmem:[%s6661_s8 + $0x20] sm:$0xff] %v2276_v15  ;;  %v2278_v16 = vpop.f32.mrb[17].mxu0 }
 0x2bc   :  { %v3182_v18 = vpop.f32.mrb[16].mxu1  ;;  %2300 = vst [vmem:[%s6661_s8 + $0x28] sm:$0xff] %v2278_v16  ;;  %v2280_v19 = vpop.f32.mrb[18].mxu0 }
 0x2bd   :  { %v3184_v44 = vpop.f32.mrb[17].mxu1  ;;  %2301 = vst [vmem:[%s6661_s8 + $0x30] sm:$0xff] %v2280_v19  ;;  %v2282_v28 = vpop.f32.mrb[19].mxu0  ;;  %v3331_v63 = vmul.f32 %v3182_v18, %v3182_v18 }
 0x2be   :  { %v3186_v40 = vpop.f32.mrb[18].mxu1  ;;  %2302 = vst [vmem:[%s6661_s8 + $0x38] sm:$0xff] %v2282_v28  ;;  %v3332_v2 = vmul.f32 %v3184_v44, %v3184_v44 }
 0x2bf   :  { %v3188_v33 = vpop.f32.mrb[19].mxu1  ;;  %v3333_v3 = vmul.f32 %v3186_v40, %v3186_v40 }
 0x2c0   :  { %v3334_v55 = vmul.f32 %v3188_v33, %v3188_v33 }
 0x2c2   :  { %v2286_v21 = vpop.f32.mrb[20].mxu0 }
 0x2c3   :  { %2303 = vst [vmem:[%s6661_s8 + $0x40] sm:$0xff] %v2286_v21  ;;  %v2288_v59 = vpop.f32.mrb[21].mxu0 }
 0x2c4   :  { %v3192_v25 = vpop.f32.mrb[20].mxu1  ;;  %2304 = vst [vmem:[%s6661_s8 + $0x48] sm:$0xff] %v2288_v59  ;;  %v2290_v26 = vpop.f32.mrb[22].mxu0 }
 0x2c5   :  { %v3194_v27 = vpop.f32.mrb[21].mxu1  ;;  %2305 = vst [vmem:[%s6661_s8 + $0x50] sm:$0xff] %v2290_v26  ;;  %v2292_v32 = vpop.f32.mrb[23].mxu0  ;;  %v3335_v5 = vmul.f32 %v3192_v25, %v3192_v25 }
 0x2c6   :  { %v3196_v35 = vpop.f32.mrb[22].mxu1  ;;  %2306 = vst [vmem:[%s6661_s8 + $0x58] sm:$0xff] %v2292_v32  ;;  %v3336_v41 = vmul.f32 %v3194_v27, %v3194_v27 }
 0x2c7   :  { %v3198_v37 = vpop.f32.mrb[23].mxu1  ;;  %v3337_v8 = vmul.f32 %v3196_v35, %v3196_v35 }
 0x2c8   :  { %v3338_v9 = vmul.f32 %v3198_v37, %v3198_v37 }
 0x332   :  { %v3298_v39 = vpop.f32.mrb[24].mxu0 }
 0x333   :  { %v3339_v43 = vmul.f32 %v3298_v39, %v3298_v39  ;;  %v3300_v46 = vpop.f32.mrb[25].mxu0 }
 0x334   :  { %v3340_v48 = vmul.f32 %v3300_v46, %v3300_v46  ;;  %v3302_v49 = vpop.f32.mrb[26].mxu0 }
 0x335   :  { %v6495_v50 = vadd.f32 %v3339_v43, %v3327_v42  ;;  %v3341_v51 = vmul.f32 %v3302_v49, %v3302_v49  ;;  %v3304_v52 = vpop.f32.mrb[27].mxu0 }
 0x336   :  { %v6497_v57 = vadd.f32 %v3340_v48, %v3328_v47  ;;  %v3342_v58 = vmul.f32 %v3304_v52, %v3304_v52 }
 0x337   :  { %4945 = vrsqrt.f32 %v6495_v50  ;;  %v6500_v60 = vadd.f32 %v3341_v51, %v3329_v56  ;;  %vm3365_vm0 = vcmp.eq.f32.partialorder %v6495_v50, inf  ;;  %vm3367_vm1 = vcmp.eq.f32.partialorder %v6495_v50, 0.0 }
 0x338   :  { %4947 = vrsqrt.f32 %v6497_v57  ;;  %v6503_v61 = vadd.f32 %v3342_v58, %v3330_v53  ;;  %vm3372_vm2 = vcmp.eq.f32.partialorder %v6497_v57, inf  ;;  %vm3374_vm3 = vcmp.eq.f32.partialorder %v6497_v57, 0.0 }
 0x339   :  { %4949 = vrsqrt.f32 %v6500_v60  ;;  %v3375_v14 = vand.u32 2147483648, %v6497_v57  ;;  %v3368_v15 = vand.u32 2147483648, %v6495_v50  ;;  %vm3379_vm4 = vcmp.eq.f32.partialorder %v6500_v60, inf }
 0x33a   :  { %4951 = vrsqrt.f32 %v6503_v61  ;;  %v3308_v62 = vpop.f32.mrb[28].mxu0  ;;  %vm3386_vm5 = vcmp.eq.f32.partialorder %v6503_v61, inf  ;;  %vm3388_vm6 = vcmp.eq.f32.partialorder %v6503_v61, 0.0  ;;  %v3389_v40 = vand.u32 2147483648, %v6503_v61 }
 0x33b   :  { %v3343_v0 = vmul.f32 %v3308_v62, %v3308_v62  ;;  %v3310_v1 = vpop.f32.mrb[29].mxu0  ;;  %vm3381_vm7 = vcmp.eq.f32.partialorder %v6500_v60, 0.0  ;;  %v3382_v25 = vand.u32 2147483648, %v6500_v60 }
 0x33c   :  { %v3344_v45 = vmul.f32 %v3310_v1, %v3310_v1  ;;  %v3312_v4 = vpop.f32.mrb[30].mxu0 }
 0x33d   :  { %v6507_v36 = vadd.f32 %v3343_v0, %v3331_v63  ;;  %v3345_v6 = vmul.f32 %v3312_v4, %v3312_v4  ;;  %v3314_v7 = vpop.f32.mrb[31].mxu0 }
 0x33e   :  { %v6509_v29 = vadd.f32 %v3344_v45, %v3332_v2  ;;  %v3346_v10 = vmul.f32 %v3314_v7, %v3314_v7 }
 0x33f   :  { %4953 = vrsqrt.f32 %v6507_v36  ;;  %v6512_v11 = vadd.f32 %v3345_v6, %v3333_v3  ;;  %vm3393_vm8 = vcmp.eq.f32.partialorder %v6507_v36, inf  ;;  %vm3395_vm11 = vcmp.eq.f32.partialorder %v6507_v36, 0.0 }
 0x340   :  { %4955 = vrsqrt.f32 %v6509_v29  ;;  %v6517_v12 = vadd.f32 %v3346_v10, %v3334_v55  ;;  %vm3400_vm9 = vcmp.eq.f32.partialorder %v6509_v29, inf  ;;  %vm3402_vm10 = vcmp.eq.f32.partialorder %v6509_v29, 0.0 }
 0x341   :  { %v4946_v13 = vpop.eup %4945  ;;  %4957 = vrsqrt.f32 %v6512_v11  ;;  %v3396_v62 = vand.u32 2147483648, %v6507_v36  ;;  %vm3407_vm12 = vcmp.eq.f32.partialorder %v6512_v11, inf  ;;  %v3410_v2 = vand.u32 2147483648, %v6512_v11 }
 0x342   :  { %v4948_v16 = vpop.eup %4947  ;;  %4959 = vrsqrt.f32 %v6517_v12  ;;  %v3318_v18 = vpop.f32.mrb[32].mxu0  ;;  %v3364_v19 = vmul.f32 %v4946_v13, %v6495_v50  ;;  %vm3414_vm13 = vcmp.eq.f32.partialorder %v6517_v12, inf  ;;  %v3417_v3 = vand.u32 2147483648, %v6517_v12 }
 0x343   :  { %v4950_v54 = vpop.eup %4949  ;;  %v3347_v44 = vmul.f32 %v3318_v18, %v3318_v18  ;;  %v3320_v28 = vpop.f32.mrb[33].mxu0  ;;  %v3371_v17 = vmul.f32 %v4948_v16, %v6497_v57  ;;  %vm3409_vm14 = vcmp.eq.f32.partialorder %v6512_v11, 0.0  ;;  %vm3416_vm15 = vcmp.eq.f32.partialorder %v6517_v12, 0.0 }
 0x344   :  { %v4952_v33 = vpop.eup %4951  ;;  %v3348_v20 = vmul.f32 %v3320_v28, %v3320_v28  ;;  %v3322_v23 = vpop.f32.mrb[34].mxu0  ;;  %v3366_v21 = vsel %vm3365_vm0, %v6495_v50, %v3364_v19  ;;  %v3378_v59 = vmul.f32 %v4950_v54, %v6500_v60 }
 0x345   :  { %v6537_v26 = vadd.f32 %v3347_v44, %v3335_v5  ;;  %v3349_v31 = vmul.f32 %v3322_v23, %v3322_v23  ;;  %v3324_v27 = vpop.f32.mrb[35].mxu0  ;;  %v3373_v32 = vsel %vm3372_vm2, %v6497_v57, %v3371_v17  ;;  %v3385_v30 = vmul.f32 %v4952_v33, %v6503_v61 }
 0x346   :  { %v6543_v35 = vadd.f32 %v3348_v20, %v3336_v41  ;;  %v3350_v37 = vmul.f32 %v3324_v27, %v3324_v27  ;;  %v3376_v34 = vsel %vm3374_vm3, %v3375_v14, %v3373_v32  ;;  %v3369_v38 = vsel %vm3367_vm1, %v3368_v15, %v3366_v21 }
 0x347   :  { %4961 = vrsqrt.f32 %v6537_v26  ;;  %v6550_v39 = vadd.f32 %v3349_v31, %v3337_v8  ;;  %v3387_v42 = vsel %vm3386_vm5, %v6503_v61, %v3385_v30  ;;  %v3380_v43 = vsel %vm3379_vm4, %v6500_v60, %v3378_v59  ;;  %v1751_v30 = vpop.xlane.xlu1 %1750 }
 0x348   :  { %4963 = vrsqrt.f32 %v6543_v35  ;;  %v6559_v46 = vadd.f32 %v3350_v37, %v3338_v9  ;;  %v3390_v47 = vsel %vm3388_vm6, %v3389_v40, %v3387_v42  ;;  %v3383_v48 = vsel %vm3381_vm7, %v3382_v25, %v3380_v43  ;;  %v1741_v25 = vpop.xlane.xlu0 %1740 }
 0x349   :  { %v4954_v49 = vpop.eup %4953  ;;  %4965 = vrsqrt.f32 %v6550_v39  ;;  %v3448_v56 = vpack.c.bf16 %v3390_v47, %v3376_v34  ;;  %v3447_v50 = vpack.c.bf16 %v3383_v48, %v3369_v38  ;;  %v3403_v60 = vand.u32 2147483648, %v6509_v29 }
 0x34a   :  { %v4956_v51 = vpop.eup %4955  ;;  %4967 = vrsqrt.f32 %v6559_v46  ;;  %v3392_v52 = vmul.f32 %v4954_v49, %v6507_v36  ;;  %vm3428_vm0 = vcmp.eq.f32.partialorder %v6543_v35, inf  ;;  %vm3430_vm1 = vcmp.eq.f32.partialorder %v6543_v35, 0.0 }
 0x34b   :  { %v4958_v53 = vpop.eup %4957  ;;  %3701 = vmatprep.mubr.bf16.mxu1 %v3448_v56  ;;  %v3399_v57 = vmul.f32 %v4956_v51, %v6509_v29  ;;  %vm3421_vm2 = vcmp.eq.f32.partialorder %v6537_v26, inf  ;;  %vm3442_vm3 = vcmp.eq.f32.partialorder %v6559_v46, inf  ;;  %v3424_v15 = vand.u32 2147483648, %v6537_v26  ;;  %v1756_v47 = vpop.xlane.xlu1 %1755 }
 0x34c   :  { %v4960_v58 = vpop.eup %4959  ;;  %3702 = vmatmul.mubr.bf16.vlgmr.msra.gmra.mrb[24].mxu1 %v3447_v50  ;;  %v3394_v61 = vsel %vm3393_vm8, %v6507_v36, %v3392_v52  ;;  %v3406_v63 = vmul.f32 %v4958_v53, %v6512_v11  ;;  %v3431_v36 = vand.u32 2147483648, %v6543_v35  ;;  %vm3435_vm4 = vcmp.eq.f32.partialorder %v6550_v39, inf  ;;  %v1746_v31 = vpop.xlane.xlu0 %1745 }
 0x34d   :  { %v3401_v0 = vsel %vm3400_vm9, %v6509_v29, %v3399_v57  ;;  %v3413_v1 = vmul.f32 %v4960_v58, %v6517_v12  ;;  %v3397_v4 = vsel %vm3395_vm11, %v3396_v62, %v3394_v61  ;;  %v3438_v54 = vand.u32 2147483648, %v6550_v39 }
 0x34e   :  { %v3408_v55 = vsel %vm3407_vm12, %v6512_v11, %v3406_v63  ;;  %v3404_v41 = vsel %vm3402_vm10, %v3403_v60, %v3401_v0  ;;  %v3445_v44 = vand.u32 2147483648, %v6559_v46  ;;  %vm3423_vm5 = vcmp.eq.f32.partialorder %v6537_v26, 0.0 }
 0x34f   :  { %v3415_v45 = vsel %vm3414_vm13, %v6517_v12, %v3413_v1  ;;  %v3411_v5 = vsel %vm3409_vm14, %v3410_v2, %v3408_v55  ;;  %vm3437_vm6 = vcmp.eq.f32.partialorder %v6550_v39, 0.0  ;;  %vm3444_vm7 = vcmp.eq.f32.partialorder %v6559_v46, 0.0  ;;  %v1766_v0 = vpop.xlane.xlu1 %1765 }
 0x350   :  { %v3418_v6 = vsel %vm3416_vm15, %v3417_v3, %v3415_v45  ;;  %v3449_v7 = vpack.c.bf16 %v3411_v5, %v3397_v4  ;;  %v1767_v27 = vand.u32 2147483647, %v1741_v25  ;;  %v1768_v34 = vand.u32 2147483647, %v1746_v31  ;;  %v1761_v57 = vpop.xlane.xlu0 %1760 }
 0x351   :  { %v4962_v8 = vpop.eup %4961  ;;  %v3450_v9 = vpack.c.bf16 %v3418_v6, %v3404_v41  ;;  %v1769_v50 = vand.u32 2147483647, %v1751_v30  ;;  %v1770_v52 = vand.u32 2147483647, %v1756_v47  ;;  %v1771_v55 = vand.u32 2147483647, %v1761_v57 }
 0x352   :  { %v4964_v10 = vpop.eup %4963  ;;  %v3420_v11 = vmul.f32 %v4962_v8, %v6537_v26  ;;  %v1772_v41 = vand.u32 2147483647, %v1766_v0 }
 0x353   :  { %v4966_v13 = vpop.eup %4965  ;;  %3711 = vmatprep.mubr.bf16.mxu1 %v3450_v9  ;;  %v3427_v12 = vmul.f32 %v4964_v10, %v6543_v35 }
 0x354   :  { %v4968_v29 = vpop.eup %4967  ;;  %3712 = vmatmul.mubr.bf16.gmra.mrb[28].mxu1 %v3449_v7  ;;  %v3422_v14 = vsel %vm3421_vm2, %v6537_v26, %v3420_v11  ;;  %v3434_v16 = vmul.f32 %v4966_v13, %v6550_v39  ;;  %v3485_v26 = vld [vmem:[%s6662_s7] sm:$0x3] }
 0x355   :  { %v3429_v18 = vsel %vm3428_vm0, %v6543_v35, %v3427_v12  ;;  %v3441_v19 = vmul.f32 %v4968_v29, %v6559_v46  ;;  %v3425_v40 = vsel %vm3423_vm5, %v3424_v15, %v3422_v14  ;;  %v3490_v32 = vrot.slane %v3485_v26, %v5847_v22 }
 0x356   :  { %v3436_v28 = vsel %vm3435_vm4, %v6550_v39, %v3434_v16  ;;  %v3432_v20 = vsel %vm3430_vm1, %v3431_v36, %v3429_v18  ;;  %v3494_v37 = vrot.slane %v3485_v26, %v5852_v24 }
 0x357   :  { %v3443_v17 = vsel %vm3442_vm3, %v6559_v46, %v3441_v19  ;;  %v3439_v33 = vsel %vm3437_vm6, %v3438_v54, %v3436_v28  ;;  %v3497_v35 = vmul.f32 %v3490_v32, %v1767_v27  ;;  %v3499_v46 = vmul.f32 %v3490_v32, %v1768_v34 }
 0x358   :  { %v3446_v23 = vsel %vm3444_vm7, %v3445_v44, %v3443_v17  ;;  %v3451_v21 = vpack.c.bf16 %v3439_v33, %v3425_v40  ;;  %v3498_v39 = vmul.f32 %v3494_v37, %v1767_v27  ;;  %v3500_v56 = vmul.f32 %v3494_v37, %v1768_v34 }
 0x359   :  { %v3452_v59 = vpack.c.bf16 %v3446_v23, %v3432_v20  ;;  %v3501_v53 = vmul.f32 %v3490_v32, %v1769_v50  ;;  %v3502_v60 = vmul.f32 %v3494_v37, %v1769_v50  ;;  %v3503_v63 = vmul.f32 %v3490_v32, %v1770_v52 }
 0x35a   :  { %v3504_v3 = vmul.f32 %v3494_v37, %v1770_v52  ;;  %v3505_v6 = vmul.f32 %v3490_v32, %v1771_v55  ;;  %v3506_v7 = vmul.f32 %v3494_v37, %v1771_v55  ;;  %v3507_v9 = vmul.f32 %v3490_v32, %v1772_v41 }
 0x35b   :  { %3721 = vmatprep.mubr.bf16.mxu1 %v3452_v59  ;;  %v3508_v13 = vmul.f32 %v3494_v37, %v1772_v41 }
 0x35c   :  { %3722 = vmatmul.mubr.bf16.gmra.mrb[32].mxu1 %v3451_v21 }
 0x41f   :  { %v3703_v38 = vpop.f32.mrb[24].mxu1 }
 0x420   :  { %v3704_v42 = vadd.f32 %v3703_v38, %v3497_v35  ;;  %v3705_v43 = vpop.f32.mrb[25].mxu1 }
 0x421   :  { %v3706_v48 = vadd.f32 %v3705_v43, %v3498_v39  ;;  %v3707_v49 = vpop.f32.mrb[26].mxu1 }
 0x422   :  { %3732 = vst [vmem:[%s6663_s9] sm:$0xff] %v3704_v42  ;;  %v3708_v22 = vadd.f32 %v3707_v49, %v3499_v46  ;;  %v3709_v51 = vpop.f32.mrb[27].mxu1 }
 0x423   :  { %3733 = vst [vmem:[%s6663_s9 + $0x8] sm:$0xff] %v3706_v48  ;;  %v3710_v24 = vadd.f32 %v3709_v51, %v3500_v56 }
 0x424   :  { %3734 = vst [vmem:[%s6663_s9 + $0x10] sm:$0xff] %v3708_v22 }
 0x425   :  { %3735 = vst [vmem:[%s6663_s9 + $0x18] sm:$0xff] %v3710_v24 }
 0x427   :  { %v3713_v58 = vpop.f32.mrb[28].mxu1 }
 0x428   :  { %v3714_v61 = vadd.f32 %v3713_v58, %v3501_v53  ;;  %v3715_v62 = vpop.f32.mrb[29].mxu1 }
 0x429   :  { %v3716_v1 = vadd.f32 %v3715_v62, %v3502_v60  ;;  %v3717_v2 = vpop.f32.mrb[30].mxu1 }
 0x42a   :  { %3736 = vst [vmem:[%s6663_s9 + $0x20] sm:$0xff] %v3714_v61  ;;  %v3718_v45 = vadd.f32 %v3717_v2, %v3503_v63  ;;  %v3719_v4 = vpop.f32.mrb[31].mxu1 }
 0x42b   :  { %3737 = vst [vmem:[%s6663_s9 + $0x28] sm:$0xff] %v3716_v1  ;;  %v3720_v5 = vadd.f32 %v3719_v4, %v3504_v3 }
 0x42c   :  { %3738 = vst [vmem:[%s6663_s9 + $0x30] sm:$0xff] %v3718_v45 }
 0x42d   :  { %3739 = vst [vmem:[%s6663_s9 + $0x38] sm:$0xff] %v3720_v5 }
 0x42f   :  { %v3723_v8 = vpop.f32.mrb[32].mxu1 }
 0x430   :  { %v3724_v10 = vadd.f32 %v3723_v8, %v3505_v6  ;;  %v3725_v11 = vpop.f32.mrb[33].mxu1 }
 0x431   :  { %v3726_v12 = vadd.f32 %v3725_v11, %v3506_v7  ;;  %v3727_v36 = vpop.f32.mrb[34].mxu1 }
 0x432   :  { %3740 = vst [vmem:[%s6663_s9 + $0x40] sm:$0xff] %v3724_v10  ;;  %v3728_v29 = vadd.f32 %v3727_v36, %v3507_v9  ;;  %v3729_v14 = vpop.f32.mrb[35].mxu1 }
 0x433   :  { %3741 = vst [vmem:[%s6663_s9 + $0x48] sm:$0xff] %v3726_v12  ;;  %v3730_v15 = vadd.f32 %v3729_v14, %v3508_v13 }
 0x434   :  { %3742 = vst [vmem:[%s6663_s9 + $0x50] sm:$0xff] %v3728_v29 }
 0x435   :  { %3743 = vst [vmem:[%s6663_s9 + $0x58] sm:$0xff] %v3730_v15 }

// kernel: custom-call.1
= control target key start
LH: loop header
LB: loop body
LE: loop exit
PB: predicated region body
PF: predicated region fallthrough
CT: control target
= control target key end

     0   :  { %s6_s0 = inlined_call_operand.vmem [shape: f32[2,16], index: 0, kind: output, shape index: {}]  }

// kernel: custom-call
= control target key start
LH: loop header
LB: loop body
LE: loop exit
PB: predicated region body
PF: predicated region fallthrough
CT: control target
= control target key end

     0   :  { %s6_s0 = inlined_call_operand.vmem [shape: bf16[2,16], index: 0, kind: output, shape index: {}]  }

</bundles_post_ra>
